<compile_context>
chip_gen: v7x
topology: tpu7x:2x2x1
jax: 0.10.0
libtpu: 0.0.40
codegen_flags: <defaults>
</compile_context>

<pallas_src>
import functools
import math

import jax
import jax.numpy as jnp
from jax import lax
from jax.experimental import pallas as pl
from jax.experimental.pallas import tpu as pltpu


# ---------------------------------------------------------------------------
# Kernel 1: GeM pooling + embedding Linear + L2 normalize   (grid over C tiles)
# ---------------------------------------------------------------------------
def _gem_embed_kernel(p_ref, feat_ref, w_emb_ref, b_emb_ref, emb_ref,
                      *, gem_eps):
    c = pl.program_id(0)

    @pl.when(c == 0)
    def _():
        emb_ref[...] = jnp.zeros_like(emb_ref)

    p = p_ref[0]                                       # GeM p (SMEM scalar)

    # Lane-dense GeM: transpose the tile so the channel tile (multiple of 128)
    # sits on the lane axis before the transcendental-heavy elementwise math.
    feat = feat_ref[...]                               # (B, TC, HW)
    feat_t = jnp.swapaxes(feat, 1, 2)                  # (B, HW, TC)  via XLU

    # GeM: (mean_hw clamp(x, eps)^p)^(1/p), per channel of this C tile.
    clamped = jnp.maximum(feat_t, gem_eps)
    powed = jnp.exp(jnp.log(clamped) * p)              # x^p  (x > 0)
    pooled = jnp.mean(powed, axis=1)                   # (B, TC) sublane reduce
    pooled = jnp.exp(jnp.log(pooled) * (1.0 / p))      # ^(1/p)

    # Partial embedding Linear: pooled @ W_emb[:, c_tile]^T  (contract C tile;
    # W_emb kept in PyTorch (E, C) layout, no transpose in the wrapper).
    # Accumulate directly into the grid-resident output block.
    emb_ref[...] += lax.dot_general(
        pooled, w_emb_ref[...],
        dimension_numbers=(((1,), (1,)), ((), ())),
        preferred_element_type=jnp.float32)

    @pl.when(c == pl.num_programs(0) - 1)
    def _():
        emb = emb_ref[...] + b_emb_ref[...]            # (B, E)
        sumsq = jnp.sum(emb * emb, axis=-1, keepdims=True)
        # F.normalize: x / max(||x||, 1e-12) == x * rsqrt(max(sumsq, 1e-24))
        emb_ref[...] = emb * lax.rsqrt(jnp.maximum(sumsq, 1e-24))


# ---------------------------------------------------------------------------
# Kernel 2: ArcMarginProduct head                       (grid over class tiles)
# ---------------------------------------------------------------------------
def _arc_head_kernel(label_ref, emb_ref, w_ref, out_ref,
                     *, s, cos_m, sin_m, th, mm, tn):
    j = pl.program_id(0)

    emb_n = emb_ref[...]                               # (B, E) pre-normalized
    w = w_ref[...].astype(jnp.float32)                 # (TN, E) bf16 -> f32
    w_sumsq = jnp.sum(w * w, axis=-1, keepdims=True)
    w_n = w * lax.rsqrt(jnp.maximum(w_sumsq, 1e-24))   # row-wise F.normalize

    cosine = lax.dot_general(
        emb_n, w_n,
        dimension_numbers=(((1,), (1,)), ((), ())),
        preferred_element_type=jnp.float32)            # (B, TN)

    # Arc margin restricted to the label column of each row.
    labels = label_ref[...]                            # (B, 1) int32
    col = j * tn + lax.broadcasted_iota(jnp.int32, cosine.shape, 1)
    one_hot = (col == labels).astype(cosine.dtype)     # (B, TN)

    cos_l = jnp.sum(cosine * one_hot, axis=-1, keepdims=True)        # (B, 1)
    sin_l = jnp.sqrt(jnp.maximum(1.0 - cos_l * cos_l, 0.0))          # clamped
    phi_l = cos_l * cos_m - sin_l * sin_m
    phi_l = jnp.where(cos_l > th, phi_l, cos_l - mm)   # easy_margin = False

    # one_hot*phi + (1-one_hot)*cosine == cosine + one_hot*(phi_l - cos_l)
    out_ref[...] = (cosine + one_hot * (phi_l - cos_l)) * s


# ---------------------------------------------------------------------------
# Wrapper
# ---------------------------------------------------------------------------
def _round_up(x, mult):
    return ((x + mult - 1) // mult) * mult


def happywhale_forward(features_nchw, labels, params, *, s=30.0, m=0.5,
                       gem_eps=1e-6, block_c=256, block_n=2048,
                       arc_weight_dtype=jnp.bfloat16):
    """features_nchw: (B, C, H, W) f32 backbone output (PyTorch layout).
       labels: (B,) int.  Returns ArcFace logits (B, num_classes)."""
    B, C, H, W = features_nchw.shape
    HW = H * W
    E = params["w_emb"].shape[0]        # embedding size
    N = params["w_arc"].shape[0]        # num classes

    # (B, C, H, W) -> (B, C, HW): contiguous reshape, no HBM transpose pass.
    feat = features_nchw.reshape(B, C, HW).astype(jnp.float32)
    labels_2d = labels.astype(jnp.int32).reshape(B, 1)

    # Pad batch to a full sublane (8) so vregs / MXU rows aren't mostly empty.
    b_pad = max(_round_up(B, 8), 8)
    if b_pad != B:
        feat = jnp.pad(feat, ((0, b_pad - B), (0, 0), (0, 0)))
        labels_2d = jnp.pad(labels_2d, ((0, b_pad - B), (0, 0)))

    # Channel tile: multiple of 128 (lane axis after the in-kernel transpose);
    # pad C instead of loading the whole feature map as one block.  Padded
    # channels hit zero W_emb columns -> contribute nothing.
    block_c = _round_up(block_c, 128)
    tc = min(block_c, _round_up(C, 128))
    c_pad = _round_up(C, tc)
    w_emb = params["w_emb"].astype(jnp.float32)
    if c_pad != C:
        feat = jnp.pad(feat, ((0, 0), (0, c_pad - C), (0, 0)))
        w_emb = jnp.pad(w_emb, ((0, 0), (0, c_pad - C)))

    p_param = params["gem_p"].astype(jnp.float32).reshape(1)
    b_emb = params["b_emb"].reshape(1, E).astype(jnp.float32)

    emb_n = pl.pallas_call(
        functools.partial(_gem_embed_kernel, gem_eps=gem_eps),
        out_shape=jax.ShapeDtypeStruct((b_pad, E), jnp.float32),
        grid=(c_pad // tc,),
        in_specs=[
            pl.BlockSpec(memory_space=pltpu.MemorySpace.SMEM),     # GeM p
            pl.BlockSpec((b_pad, tc, HW), lambda c: (0, c, 0)),    # feature tile
            pl.BlockSpec((E, tc), lambda c: (0, c)),               # W_emb tile
            pl.BlockSpec((1, E), lambda c: (0, 0)),                # bias resident
        ],
        out_specs=pl.BlockSpec((b_pad, E), lambda c: (0, 0)),      # resident acc
        compiler_params=pltpu.CompilerParams(
            dimension_semantics=("arbitrary",),
            vmem_limit_bytes=32 * 1024 * 1024),
    )(p_param, feat, w_emb, b_emb)

    # Class-tile size: multiple of 128 -> lane-dense output stores.  Cap tn so
    # the double-buffered streamed weight tile stays <= ~8 MiB even when
    # block_n >= N (v7x has only 64 MiB physical VMEM per TC).
    block_n = _round_up(block_n, 128)
    tn = min(block_n, _round_up(N, 128))
    w_itemsize = jnp.dtype(arc_weight_dtype).itemsize
    max_tn = max(128, ((8 * 1024 * 1024) // (2 * E * w_itemsize)) // 128 * 128)
    tn = min(tn, max_tn)
    n_pad = _round_up(N, tn)

    # Stream the ArcMargin weight as bf16 (halves the HBM-BW-bound stream);
    # the in-kernel row L2-normalization cancels per-row scale error.
    w_arc = params["w_arc"].astype(arc_weight_dtype)
    if n_pad != N:
        # Zero rows -> zero cosine; padded columns are sliced off below.
        w_arc = jnp.pad(w_arc, ((0, n_pad - N), (0, 0)))

    arc_kernel = functools.partial(
        _arc_head_kernel, s=s, cos_m=math.cos(m), sin_m=math.sin(m),
        th=math.cos(math.pi - m), mm=math.sin(math.pi - m) * m, tn=tn)

    logits = pl.pallas_call(
        arc_kernel,
        out_shape=jax.ShapeDtypeStruct((b_pad, n_pad), jnp.float32),
        grid=(n_pad // tn,),
        in_specs=[
            pl.BlockSpec((b_pad, 1), lambda j: (0, 0)),   # labels (resident)
            pl.BlockSpec((b_pad, E), lambda j: (0, 0)),   # emb_n (resident)
            pl.BlockSpec((tn, E), lambda j: (j, 0)),      # W_arc tile (streamed)
        ],
        out_specs=pl.BlockSpec((b_pad, tn), lambda j: (0, j)),
        compiler_params=pltpu.CompilerParams(
            dimension_semantics=("parallel",),            # megacore hint
            vmem_limit_bytes=32 * 1024 * 1024),
    )(labels_2d, emb_n, w_arc)

    return logits[:B, :N]


# ---------------------------------------------------------------------------
# Parameter init (PyTorch layouts, no pre-transposes needed)
# ---------------------------------------------------------------------------
def init_params(key, in_features, embedding_size, num_classes):
    k1, k2, k3 = jax.random.split(key, 3)
    # nn.Linear(in_features, embedding_size): weight (E, C), bias (E,)
    lim_lin = 1.0 / math.sqrt(in_features)
    w_emb = jax.random.uniform(k1, (embedding_size, in_features),
                               jnp.float32, -lim_lin, lim_lin)
    b_emb = jax.random.uniform(k2, (embedding_size,),
                               jnp.float32, -lim_lin, lim_lin)
    # ArcMarginProduct weight (out_features, in_features), xavier_uniform.
    lim_xav = math.sqrt(6.0 / (num_classes + embedding_size))
    w_arc = jax.random.uniform(k3, (num_classes, embedding_size),
                               jnp.float32, -lim_xav, lim_xav)
    gem_p = jnp.array([3.0], jnp.float32)
    return {"w_emb": w_emb, "b_emb": b_emb, "w_arc": w_arc, "gem_p": gem_p}


# ---------------------------------------------------------------------------
# Pure-JAX reference (mirrors the PyTorch forward) for a sanity check
# ---------------------------------------------------------------------------
def _reference(features_nchw, labels, params, s=30.0, m=0.5, gem_eps=1e-6,
               arc_w=None):
    p = params["gem_p"][0]
    x = jnp.maximum(features_nchw, gem_eps)
    pooled = jnp.mean(x ** p, axis=(2, 3)) ** (1.0 / p)            # (B, C)
    emb = pooled @ params["w_emb"].T + params["b_emb"]
    emb_n = emb / jnp.maximum(
        jnp.sqrt(jnp.sum(emb * emb, axis=-1, keepdims=True)), 1e-12)
    w = params["w_arc"] if arc_w is None else arc_w
    w_n = w / jnp.maximum(
        jnp.sqrt(jnp.sum(w * w, axis=-1, keepdims=True)), 1e-12)
    cosine = emb_n @ w_n.T
    sine = jnp.sqrt(jnp.maximum(1.0 - cosine * cosine, 0.0))
    phi = cosine * math.cos(m) - sine * math.sin(m)
    phi = jnp.where(cosine > math.cos(math.pi - m), phi,
                    cosine - math.sin(math.pi - m) * m)
    one_hot = jax.nn.one_hot(labels, cosine.shape[1], dtype=cosine.dtype)
    return (one_hot * phi + (1.0 - one_hot) * cosine) * s


if __name__ == "__main__":
    # Small shapes consistent with the module (scaled down):
    #   backbone num_features 1280 -> 256, embedding 512 -> 128,
    #   output_dim 15587 -> 512, post-backbone spatial 14x14 -> 8x8.
    B, C, H, W = 2, 256, 8, 8
    EMB, N_CLASSES = 128, 512

    key = jax.random.PRNGKey(0)
    k_feat, k_lab, k_par = jax.random.split(key, 3)

    features = jax.random.normal(k_feat, (B, C, H, W), jnp.float32)
    labels = jax.random.randint(k_lab, (B,), 0, N_CLASSES, jnp.int32)
    params = init_params(k_par, C, EMB, N_CLASSES)

    # Path 1: full-f32 weight stream, checked against the exact f32 reference.
    # block_c=128 -> 2 C-tiles; block_n=256 -> 2 class tiles (exercises both
    # pipelines, batch padding, and the resident-output accumulator).
    out_f32 = happywhale_forward(features, labels, params,
                                 block_c=128, block_n=256,
                                 arc_weight_dtype=jnp.float32)
    jax.block_until_ready(out_f32)
    assert out_f32.shape == (B, N_CLASSES) and out_f32.dtype == jnp.float32
    assert bool(jnp.all(jnp.isfinite(out_f32)))
    ref_f32 = _reference(features, labels, params)
    assert bool(jnp.allclose(out_f32, ref_f32, atol=1e-1, rtol=0.0)), \
        float(jnp.max(jnp.abs(out_f32 - ref_f32)))

    # Path 2 (default): bf16-streamed ArcMargin weight, checked against a
    # reference using the identically-cast weight (row-normalization cancels
    # per-row scale, so the remaining error is only directional).
    out_bf16 = happywhale_forward(features, labels, params,
                                  block_c=128, block_n=256)
    jax.block_until_ready(out_bf16)
    assert out_bf16.shape == (B, N_CLASSES) and out_bf16.dtype == jnp.float32
    assert bool(jnp.all(jnp.isfinite(out_bf16)))
    arc_w_cast = params["w_arc"].astype(jnp.bfloat16).astype(jnp.float32)
    ref_bf16 = _reference(features, labels, params, arc_w=arc_w_cast)
    assert bool(jnp.allclose(out_bf16, ref_bf16, atol=1e-1, rtol=0.0)), \
        float(jnp.max(jnp.abs(out_bf16 - ref_bf16)))

    print("KERNEL_OK")
</pallas_src>

<mosaic_0001>
module attributes {stable_mosaic.version = 11 : i64} {
  func.func @_gem_embed_kernel(%arg0: i32, %arg1: memref<1xf32, #tpu.memory_space<smem>>, %arg2: memref<8x128x64xf32, #tpu.memory_space<vmem>>, %arg3: memref<128x128xf32, #tpu.memory_space<vmem>>, %arg4: memref<1x128xf32, #tpu.memory_space<vmem>>, %arg5: memref<8x128xf32, #tpu.memory_space<vmem>>) attributes {dimension_semantics = [#tpu.dimension_semantics<arbitrary>], iteration_bounds = array<i64: 2>, scalar_prefetch = 0 : i64, scratch_operands = 0 : i64, tpu.core_type = #tpu.core_type<tc>, window_params = [{transform_indices = @transform_0, window_bounds = array<i64: 1>}, {transform_indices = @transform_1, window_bounds = array<i64: 8, 128, 64>}, {transform_indices = @transform_2, window_bounds = array<i64: 128, 128>}, {pipeline_mode = #tpu.pipeline_mode<synchronous>, transform_indices = @transform_3, window_bounds = array<i64: 1, 128>}, {pipeline_mode = #tpu.pipeline_mode<synchronous>, transform_indices = @transform_4, window_bounds = array<i64: 8, 128>}]} {
    %c0_i32 = arith.constant 0 : i32
    %0 = arith.cmpi eq, %arg0, %c0_i32 : i32
    %1 = arith.extui %0 : i1 to i32
    %c0_i32_0 = arith.constant 0 : i32
    %2 = arith.cmpi ne, %1, %c0_i32_0 : i32
    scf.if %2 {
      %cst_15 = arith.constant 0.000000e+00 : f32
      %28 = vector.broadcast %cst_15 : f32 to vector<8x128xf32>
      %c0_16 = arith.constant 0 : index
      %c0_17 = arith.constant 0 : index
      %29 = vector.load %arg5[%c0_16, %c0_17] : memref<8x128xf32, #tpu.memory_space<vmem>>, vector<8x128xf32>
      tpu.vector_store %arg5[%c0_16, %c0_17], %28 {strides = array<i32>} : memref<8x128xf32, #tpu.memory_space<vmem>>, vector<8x128xf32>,
    } else {
    }
    %c0 = arith.constant 0 : index
    %3 = memref.load %arg1[%c0] : memref<1xf32, #tpu.memory_space<smem>>
    %c0_1 = arith.constant 0 : index
    %c0_2 = arith.constant 0 : index
    %c0_3 = arith.constant 0 : index
    %4 = vector.load %arg2[%c0_1, %c0_2, %c0_3] : memref<8x128x64xf32, #tpu.memory_space<vmem>>, vector<8x128x64xf32>
    %5 = tpu.transpose %4, [0, 2, 1] : vector<8x128x64xf32> -> vector<8x64x128xf32>
    %cst = arith.constant 9.99999997E-7 : f32
    %6 = vector.broadcast %cst : f32 to vector<8x64x128xf32>
    %7 = arith.maximumf %5, %6 : vector<8x64x128xf32>
    %8 = math.log %7 : vector<8x64x128xf32>
    %9 = vector.broadcast %3 : f32 to vector<8x64x128xf32>
    %10 = arith.mulf %8, %9 : vector<8x64x128xf32>
    %11 = math.exp %10 : vector<8x64x128xf32>
    %cst_4 = arith.constant dense<0.000000e+00> : vector<8x128xf32>
    %12 = vector.multi_reduction <add>, %11, %cst_4 [1] : vector<8x64x128xf32> to vector<8x128xf32>
    %cst_5 = arith.constant 6.400000e+01 : f32
    %13 = vector.broadcast %cst_5 : f32 to vector<8x128xf32>
    %14 = arith.divf %12, %13 : vector<8x128xf32>
    %15 = math.log %14 : vector<8x128xf32>
    %cst_6 = arith.constant 1.000000e+00 : f32
    %16 = arith.divf %cst_6, %3 : f32
    %17 = vector.broadcast %16 : f32 to vector<8x128xf32>
    %18 = arith.mulf %15, %17 : vector<8x128xf32>
    %19 = math.exp %18 : vector<8x128xf32>
    %c0_7 = arith.constant 0 : index
    %c0_8 = arith.constant 0 : index
    %20 = vector.load %arg5[%c0_7, %c0_8] : memref<8x128xf32, #tpu.memory_space<vmem>>, vector<8x128xf32>
    %c0_9 = arith.constant 0 : index
    %c0_10 = arith.constant 0 : index
    %21 = vector.load %arg3[%c0_9, %c0_10] : memref<128x128xf32, #tpu.memory_space<vmem>>, vector<128x128xf32>
    %cst_11 = arith.constant dense<0.000000e+00> : vector<8x128xf32>
    %22 = tpu.matmul %19, %21, %cst_11 {dimension_numbers = #tpu.dot_dimension_numbers<[1], [1], [0], [0], [0, 0, 1, 0], [], []>} : vector<8x128xf32>, vector<128x128xf32>, vector<8x128xf32> -> vector<8x128xf32>
    %23 = arith.addf %20, %22 : vector<8x128xf32>
    %c0_12 = arith.constant 0 : index
    %c0_13 = arith.constant 0 : index
    %24 = vector.load %arg5[%c0_12, %c0_13] : memref<8x128xf32, #tpu.memory_space<vmem>>, vector<8x128xf32>
    tpu.vector_store %arg5[%c0_12, %c0_13], %23 {strides = array<i32>} : memref<8x128xf32, #tpu.memory_space<vmem>>, vector<8x128xf32>,
    %c1_i32 = arith.constant 1 : i32
    %25 = arith.cmpi eq, %arg0, %c1_i32 : i32
    %26 = arith.extui %25 : i1 to i32
    %c0_i32_14 = arith.constant 0 : i32
    %27 = arith.cmpi ne, %26, %c0_i32_14 : i32
    scf.if %27 {
      %c0_15 = arith.constant 0 : index
      %c0_16 = arith.constant 0 : index
      %28 = vector.load %arg5[%c0_15, %c0_16] : memref<8x128xf32, #tpu.memory_space<vmem>>, vector<8x128xf32>
      %c0_17 = arith.constant 0 : index
      %c0_18 = arith.constant 0 : index
      %29 = vector.load %arg4[%c0_17, %c0_18] : memref<1x128xf32, #tpu.memory_space<vmem>>, vector<1x128xf32>
      %30 = vector.broadcast %29 : vector<1x128xf32> to vector<8x128xf32>
      %31 = arith.addf %28, %30 : vector<8x128xf32>
      %32 = arith.mulf %31, %31 : vector<8x128xf32>
      %cst_19 = arith.constant dense<0.000000e+00> : vector<8xf32>
      %33 = vector.multi_reduction <add>, %32, %cst_19 [1] : vector<8x128xf32> to vector<8xf32>
      %34 = vector.shape_cast %33 : vector<8xf32> to vector<8x1xf32>
      %cst_20 = arith.constant 1.000000e-24 : f32
      %35 = vector.broadcast %cst_20 : f32 to vector<8x1xf32>
      %36 = arith.maximumf %34, %35 : vector<8x1xf32>
      %37 = math.rsqrt %36 : vector<8x1xf32>
      %38 = vector.broadcast %37 : vector<8x1xf32> to vector<8x128xf32>
      %39 = arith.mulf %31, %38 : vector<8x128xf32>
      %c0_21 = arith.constant 0 : index
      %c0_22 = arith.constant 0 : index
      %40 = vector.load %arg5[%c0_21, %c0_22] : memref<8x128xf32, #tpu.memory_space<vmem>>, vector<8x128xf32>
      tpu.vector_store %arg5[%c0_21, %c0_22], %39 {strides = array<i32>} : memref<8x128xf32, #tpu.memory_space<vmem>>, vector<8x128xf32>,
    } else {
    }
    return
  }
  func.func @transform_0(%arg0: i32) -> i32 {
    %c0_i32 = arith.constant 0 : i32
    %c0_i32_0 = arith.constant 0 : i32
    return %c0_i32 : i32
  }
  func.func @transform_1(%arg0: i32) -> (i32, i32, i32) {
    %c0_i32 = arith.constant 0 : i32
    %c0_i32_0 = arith.constant 0 : i32
    %c0_i32_1 = arith.constant 0 : i32
    return %c0_i32, %arg0, %c0_i32_0 : i32, i32, i32
  }
  func.func @transform_2(%arg0: i32) -> (i32, i32) {
    %c0_i32 = arith.constant 0 : i32
    %c0_i32_0 = arith.constant 0 : i32
    return %c0_i32, %arg0 : i32, i32
  }
  func.func @transform_3(%arg0: i32) -> (i32, i32) {
    %c0_i32 = arith.constant 0 : i32
    %c0_i32_0 = arith.constant 0 : i32
    %c0_i32_1 = arith.constant 0 : i32
    return %c0_i32, %c0_i32_0 : i32, i32
  }
  func.func @transform_4(%arg0: i32) -> (i32, i32) {
    %c0_i32 = arith.constant 0 : i32
    %c0_i32_0 = arith.constant 0 : i32
    %c0_i32_1 = arith.constant 0 : i32
    return %c0_i32, %c0_i32_0 : i32, i32
  }
}

</mosaic_0001>

<bundles_post_ra>
// kernel: tpu_custom_call.1
= control target key start
LH: loop header
LB: loop body
LE: loop exit
PB: predicated region body
PF: predicated region fallthrough
CT: control target
= control target key end

     0   :  { %s3095_s0 = inlined_call_operand.<no memory space> [shape: f32[1], index: 0, kind: input, shape index: {}]   ;;  %s3096_s1 = inlined_call_operand.vmem [shape: f32[8,256,64], index: 1, kind: input, shape index: {}]   ;;  %s3097_s2 = inlined_call_operand.vmem [shape: f32[128,256], index: 2, kind: input, shape index: {}]   ;;  %s3098_s3 = inlined_call_operand.vmem [shape: f32[1,128], index: 3, kind: input, shape index: {}]   ;;  %s3099_s4 = inlined_call_operand.hbm [shape: f32[8,128], index: 4, kind: output, shape index: {}]  }
   0x1   :  { %9 = sst [smem:[#allocation2]] %s3095_s0 }
   0x2   :  { %10 = vsyncpa [#allocation6], 0  ;;  %s2488_s17 = smov 0   ;;  %s2490_s18 = smov 0  }
   0x3   :  { %s2492_s19 = smov 0  }
   0x4 LB: > { %s2504_s0 = sadd.s32 4294967295, %s2453_s19   ;;  %s2507_s20 = sadd.s32 1, %s2453_s19   ;;  %s2453_s19 = sphi %s2492_s19, %s3103_s19   ;;  %s2449_s18 = sphi %s2490_s18, %s3102_s18   ;;  %s2445_s17 = sphi %s2488_s17, %s3101_s17  }
   0x5   : > { %s41_s21 = ssub.s32 %s2453_s19, %s2507_s20  ;;  %s44_s22 = sadd.s32 1, %s2449_s18 }
   0x6   : > { %p42_p0 = scmp.eq.s32.totalorder %s41_s21, 0  ;;  %p51_p1 = scmp.ne.s32.totalorder %s2449_s18, %s2445_s17 }
   0x7   : > { %p52_p2 = scmp.eq.s32.totalorder %s2453_s19, 0  ;;  %p1979_p4 = scmp.ge.s32.totalorder %s2453_s19, 2 }
   0x8   : > { %s2516_s23 = scalar_select %p42_p0, %s2449_s18, %s44_s22  }
   0x9   : > { %p2518_p3 = por %p52_p2, %p51_p1  ;;  %151 = sbr.rel (%p1979_p4) target bundleno = 96 (0x60), region = 24 }
  0x10   : > { %154 = sbr.rel (!%p2518_p3) target bundleno = 84 (0x54), region = 28  ;;  %s156_s25 = sand.u32 (%p2518_p3), 1, %s2449_s18  }
  0x11   : > { %s1995_s26 = sshll.u32 (%p2518_p3), %s2453_s19, 7  ;;  %s1980_s27 = sshll.u32 (%p2518_p3), %s156_s25, 10 }
  0x12   : > { %s2530_s30 = scalar_lea.vmem (%p2518_p3), %s3096_s1, %s1995_s26  ;;  %s2535_s5 = scalar_lea.vmem (%p2518_p3), [#allocation3], %s1980_s27 }
  0x13   : > { %v443_v0 = vld [vmem:[%s2530_s30] sm:$0xff] (%p2518_p3)  ;;  %v445_v1 = vld [vmem:[%s2530_s30 + $0x8] sm:$0xff] (%p2518_p3)  ;;  %v447_v2 = vld [vmem:[%s2530_s30 + $0x10] sm:$0xff] (%p2518_p3) }
  0x14   : > { %444 = vst [vmem:[%s2535_s5] sm:$0xff] (%p2518_p3), %v443_v0  ;;  %446 = vst [vmem:[%s2535_s5 + $0x8] sm:$0xff] (%p2518_p3), %v445_v1  ;;  %v449_v3 = vld [vmem:[%s2530_s30 + $0x18] sm:$0xff] (%p2518_p3)  ;;  %v451_v4 = vld [vmem:[%s2530_s30 + $0x20] sm:$0xff] (%p2518_p3) }
  0x15   : > { %448 = vst [vmem:[%s2535_s5 + $0x10] sm:$0xff] (%p2518_p3), %v447_v2  ;;  %v453_v5 = vld [vmem:[%s2530_s30 + $0x28] sm:$0xff] (%p2518_p3)  ;;  %450 = vst [vmem:[%s2535_s5 + $0x18] sm:$0xff] (%p2518_p3), %v449_v3  ;;  %v455_v6 = vld [vmem:[%s2530_s30 + $0x30] sm:$0xff] (%p2518_p3) }
  0x16   : > { %452 = vst [vmem:[%s2535_s5 + $0x20] sm:$0xff] (%p2518_p3), %v451_v4  ;;  %454 = vst [vmem:[%s2535_s5 + $0x28] sm:$0xff] (%p2518_p3), %v453_v5  ;;  %v457_v7 = vld [vmem:[%s2530_s30 + $0x38] sm:$0xff] (%p2518_p3)  ;;  %v459_v8 = vld [vmem:[%s2530_s30 + $0x40] sm:$0xff] (%p2518_p3) }
  0x17   : > { %456 = vst [vmem:[%s2535_s5 + $0x30] sm:$0xff] %v455_v6  ;;  %458 = vst [vmem:[%s2535_s5 + $0x38] sm:$0xff] %v457_v7  ;;  %v461_v9 = vld [vmem:[%s2530_s30 + $0x48] sm:$0xff]  ;;  %v463_v10 = vld [vmem:[%s2530_s30 + $0x50] sm:$0xff] }
  0x18   : > { %460 = vst [vmem:[%s2535_s5 + $0x40] sm:$0xff] %v459_v8  ;;  %v465_v11 = vld [vmem:[%s2530_s30 + $0x58] sm:$0xff]  ;;  %462 = vst [vmem:[%s2535_s5 + $0x48] sm:$0xff] %v461_v9  ;;  %v467_v12 = vld [vmem:[%s2530_s30 + $0x60] sm:$0xff] }
  0x19   : > { %464 = vst [vmem:[%s2535_s5 + $0x50] sm:$0xff] %v463_v10  ;;  %466 = vst [vmem:[%s2535_s5 + $0x58] sm:$0xff] %v465_v11  ;;  %v469_v13 = vld [vmem:[%s2530_s30 + $0x68] sm:$0xff]  ;;  %v471_v14 = vld [vmem:[%s2530_s30 + $0x70] sm:$0xff] }
  0x1a   : > { %468 = vst [vmem:[%s2535_s5 + $0x60] sm:$0xff] %v467_v12  ;;  %470 = vst [vmem:[%s2535_s5 + $0x68] sm:$0xff] %v469_v13  ;;  %v473_v15 = vld [vmem:[%s2530_s30 + $0x78] sm:$0xff]  ;;  %v475_v16 = vld [vmem:[%s2530_s30 + $0x100] sm:$0xff] }
  0x1b   : > { %472 = vst [vmem:[%s2535_s5 + $0x70] sm:$0xff] %v471_v14  ;;  %v477_v17 = vld [vmem:[%s2530_s30 + $0x108] sm:$0xff]  ;;  %474 = vst [vmem:[%s2535_s5 + $0x78] sm:$0xff] %v473_v15  ;;  %v479_v18 = vld [vmem:[%s2530_s30 + $0x110] sm:$0xff] }
  0x1c   : > { %476 = vst [vmem:[%s2535_s5 + $0x80] sm:$0xff] %v475_v16  ;;  %478 = vst [vmem:[%s2535_s5 + $0x88] sm:$0xff] %v477_v17  ;;  %v481_v19 = vld [vmem:[%s2530_s30 + $0x118] sm:$0xff]  ;;  %v483_v20 = vld [vmem:[%s2530_s30 + $0x120] sm:$0xff] }
  0x1d   : > { %480 = vst [vmem:[%s2535_s5 + $0x90] sm:$0xff] %v479_v18  ;;  %482 = vst [vmem:[%s2535_s5 + $0x98] sm:$0xff] %v481_v19  ;;  %v485_v21 = vld [vmem:[%s2530_s30 + $0x128] sm:$0xff]  ;;  %v487_v22 = vld [vmem:[%s2530_s30 + $0x130] sm:$0xff] }
  0x1e   : > { %484 = vst [vmem:[%s2535_s5 + $0xa0] sm:$0xff] %v483_v20  ;;  %v489_v23 = vld [vmem:[%s2530_s30 + $0x138] sm:$0xff]  ;;  %486 = vst [vmem:[%s2535_s5 + $0xa8] sm:$0xff] %v485_v21  ;;  %v491_v24 = vld [vmem:[%s2530_s30 + $0x140] sm:$0xff] }
  0x1f   : > { %488 = vst [vmem:[%s2535_s5 + $0xb0] sm:$0xff] %v487_v22  ;;  %490 = vst [vmem:[%s2535_s5 + $0xb8] sm:$0xff] %v489_v23  ;;  %v493_v25 = vld [vmem:[%s2530_s30 + $0x148] sm:$0xff]  ;;  %v495_v26 = vld [vmem:[%s2530_s30 + $0x150] sm:$0xff] }
  0x20   : > { %492 = vst [vmem:[%s2535_s5 + $0xc0] sm:$0xff] %v491_v24  ;;  %494 = vst [vmem:[%s2535_s5 + $0xc8] sm:$0xff] %v493_v25  ;;  %v497_v27 = vld [vmem:[%s2530_s30 + $0x158] sm:$0xff]  ;;  %v499_v28 = vld [vmem:[%s2530_s30 + $0x160] sm:$0xff] }
  0x21   : > { %496 = vst [vmem:[%s2535_s5 + $0xd0] sm:$0xff] %v495_v26  ;;  %v501_v29 = vld [vmem:[%s2530_s30 + $0x168] sm:$0xff]  ;;  %498 = vst [vmem:[%s2535_s5 + $0xd8] sm:$0xff] %v497_v27  ;;  %v503_v30 = vld [vmem:[%s2530_s30 + $0x170] sm:$0xff] }
  0x22   : > { %500 = vst [vmem:[%s2535_s5 + $0xe0] sm:$0xff] %v499_v28  ;;  %502 = vst [vmem:[%s2535_s5 + $0xe8] sm:$0xff] %v501_v29  ;;  %v505_v31 = vld [vmem:[%s2530_s30 + $0x178] sm:$0xff]  ;;  %v507_v32 = vld [vmem:[%s2530_s30 + $0x200] sm:$0xff] }
  0x23   : > { %504 = vst [vmem:[%s2535_s5 + $0xf0] sm:$0xff] %v503_v30  ;;  %506 = vst [vmem:[%s2535_s5 + $0xf8] sm:$0xff] %v505_v31  ;;  %v509_v33 = vld [vmem:[%s2530_s30 + $0x208] sm:$0xff]  ;;  %v511_v34 = vld [vmem:[%s2530_s30 + $0x210] sm:$0xff] }
  0x24   : > { %508 = vst [vmem:[%s2535_s5 + $0x100] sm:$0xff] %v507_v32  ;;  %v513_v35 = vld [vmem:[%s2530_s30 + $0x218] sm:$0xff]  ;;  %510 = vst [vmem:[%s2535_s5 + $0x108] sm:$0xff] %v509_v33  ;;  %v515_v36 = vld [vmem:[%s2530_s30 + $0x220] sm:$0xff] }
  0x25   : > { %512 = vst [vmem:[%s2535_s5 + $0x110] sm:$0xff] %v511_v34  ;;  %514 = vst [vmem:[%s2535_s5 + $0x118] sm:$0xff] %v513_v35  ;;  %v517_v37 = vld [vmem:[%s2530_s30 + $0x228] sm:$0xff]  ;;  %v519_v38 = vld [vmem:[%s2530_s30 + $0x230] sm:$0xff] }
  0x26   : > { %516 = vst [vmem:[%s2535_s5 + $0x120] sm:$0xff] %v515_v36  ;;  %518 = vst [vmem:[%s2535_s5 + $0x128] sm:$0xff] %v517_v37  ;;  %v521_v39 = vld [vmem:[%s2530_s30 + $0x238] sm:$0xff]  ;;  %v523_v40 = vld [vmem:[%s2530_s30 + $0x240] sm:$0xff] }
  0x27   : > { %520 = vst [vmem:[%s2535_s5 + $0x130] sm:$0xff] %v519_v38  ;;  %v525_v41 = vld [vmem:[%s2530_s30 + $0x248] sm:$0xff]  ;;  %522 = vst [vmem:[%s2535_s5 + $0x138] sm:$0xff] %v521_v39  ;;  %v527_v42 = vld [vmem:[%s2530_s30 + $0x250] sm:$0xff] }
  0x28   : > { %524 = vst [vmem:[%s2535_s5 + $0x140] sm:$0xff] %v523_v40  ;;  %526 = vst [vmem:[%s2535_s5 + $0x148] sm:$0xff] %v525_v41  ;;  %v529_v43 = vld [vmem:[%s2530_s30 + $0x258] sm:$0xff]  ;;  %v531_v44 = vld [vmem:[%s2530_s30 + $0x260] sm:$0xff] }
  0x29   : > { %528 = vst [vmem:[%s2535_s5 + $0x150] sm:$0xff] %v527_v42  ;;  %530 = vst [vmem:[%s2535_s5 + $0x158] sm:$0xff] %v529_v43  ;;  %v533_v45 = vld [vmem:[%s2530_s30 + $0x268] sm:$0xff]  ;;  %v535_v46 = vld [vmem:[%s2530_s30 + $0x270] sm:$0xff] }
  0x2a   : > { %532 = vst [vmem:[%s2535_s5 + $0x160] sm:$0xff] %v531_v44  ;;  %v537_v47 = vld [vmem:[%s2530_s30 + $0x278] sm:$0xff]  ;;  %534 = vst [vmem:[%s2535_s5 + $0x168] sm:$0xff] %v533_v45  ;;  %v539_v48 = vld [vmem:[%s2530_s30 + $0x300] sm:$0xff] }
  0x2b   : > { %536 = vst [vmem:[%s2535_s5 + $0x170] sm:$0xff] %v535_v46  ;;  %538 = vst [vmem:[%s2535_s5 + $0x178] sm:$0xff] %v537_v47  ;;  %v541_v49 = vld [vmem:[%s2530_s30 + $0x308] sm:$0xff]  ;;  %v543_v50 = vld [vmem:[%s2530_s30 + $0x310] sm:$0xff] }
  0x2c   : > { %540 = vst [vmem:[%s2535_s5 + $0x180] sm:$0xff] %v539_v48  ;;  %542 = vst [vmem:[%s2535_s5 + $0x188] sm:$0xff] %v541_v49  ;;  %v545_v51 = vld [vmem:[%s2530_s30 + $0x318] sm:$0xff]  ;;  %v547_v52 = vld [vmem:[%s2530_s30 + $0x320] sm:$0xff] }
  0x2d   : > { %544 = vst [vmem:[%s2535_s5 + $0x190] sm:$0xff] %v543_v50  ;;  %v549_v53 = vld [vmem:[%s2530_s30 + $0x328] sm:$0xff]  ;;  %546 = vst [vmem:[%s2535_s5 + $0x198] sm:$0xff] %v545_v51  ;;  %v551_v54 = vld [vmem:[%s2530_s30 + $0x330] sm:$0xff] }
  0x2e   : > { %548 = vst [vmem:[%s2535_s5 + $0x1a0] sm:$0xff] %v547_v52  ;;  %550 = vst [vmem:[%s2535_s5 + $0x1a8] sm:$0xff] %v549_v53  ;;  %v553_v55 = vld [vmem:[%s2530_s30 + $0x338] sm:$0xff]  ;;  %v555_v56 = vld [vmem:[%s2530_s30 + $0x340] sm:$0xff] }
  0x2f   : > { %552 = vst [vmem:[%s2535_s5 + $0x1b0] sm:$0xff] %v551_v54  ;;  %554 = vst [vmem:[%s2535_s5 + $0x1b8] sm:$0xff] %v553_v55  ;;  %v557_v57 = vld [vmem:[%s2530_s30 + $0x348] sm:$0xff]  ;;  %v559_v58 = vld [vmem:[%s2530_s30 + $0x350] sm:$0xff] }
  0x30   : > { %556 = vst [vmem:[%s2535_s5 + $0x1c0] sm:$0xff] %v555_v56  ;;  %v561_v59 = vld [vmem:[%s2530_s30 + $0x358] sm:$0xff]  ;;  %558 = vst [vmem:[%s2535_s5 + $0x1c8] sm:$0xff] %v557_v57  ;;  %v563_v60 = vld [vmem:[%s2530_s30 + $0x360] sm:$0xff] }
  0x31   : > { %560 = vst [vmem:[%s2535_s5 + $0x1d0] sm:$0xff] %v559_v58  ;;  %562 = vst [vmem:[%s2535_s5 + $0x1d8] sm:$0xff] %v561_v59  ;;  %v565_v61 = vld [vmem:[%s2530_s30 + $0x368] sm:$0xff]  ;;  %v567_v62 = vld [vmem:[%s2530_s30 + $0x370] sm:$0xff] }
  0x32   : > { %564 = vst [vmem:[%s2535_s5 + $0x1e0] sm:$0xff] %v563_v60  ;;  %566 = vst [vmem:[%s2535_s5 + $0x1e8] sm:$0xff] %v565_v61  ;;  %v569_v63 = vld [vmem:[%s2530_s30 + $0x378] sm:$0xff]  ;;  %v571_v0 = vld [vmem:[%s2530_s30 + $0x400] sm:$0xff] }
  0x33   : > { %568 = vst [vmem:[%s2535_s5 + $0x1f0] sm:$0xff] %v567_v62  ;;  %v573_v1 = vld [vmem:[%s2530_s30 + $0x408] sm:$0xff]  ;;  %570 = vst [vmem:[%s2535_s5 + $0x1f8] sm:$0xff] %v569_v63  ;;  %v575_v2 = vld [vmem:[%s2530_s30 + $0x410] sm:$0xff] }
  0x34   : > { %572 = vst [vmem:[%s2535_s5 + $0x200] sm:$0xff] %v571_v0  ;;  %574 = vst [vmem:[%s2535_s5 + $0x208] sm:$0xff] %v573_v1  ;;  %v577_v3 = vld [vmem:[%s2530_s30 + $0x418] sm:$0xff]  ;;  %v579_v4 = vld [vmem:[%s2530_s30 + $0x420] sm:$0xff] }
  0x35   : > { %576 = vst [vmem:[%s2535_s5 + $0x210] sm:$0xff] %v575_v2  ;;  %578 = vst [vmem:[%s2535_s5 + $0x218] sm:$0xff] %v577_v3  ;;  %v581_v5 = vld [vmem:[%s2530_s30 + $0x428] sm:$0xff]  ;;  %v583_v6 = vld [vmem:[%s2530_s30 + $0x430] sm:$0xff] }
  0x36   : > { %580 = vst [vmem:[%s2535_s5 + $0x220] sm:$0xff] %v579_v4  ;;  %v585_v7 = vld [vmem:[%s2530_s30 + $0x438] sm:$0xff]  ;;  %582 = vst [vmem:[%s2535_s5 + $0x228] sm:$0xff] %v581_v5  ;;  %v587_v8 = vld [vmem:[%s2530_s30 + $0x440] sm:$0xff] }
  0x37   : > { %584 = vst [vmem:[%s2535_s5 + $0x230] sm:$0xff] %v583_v6  ;;  %586 = vst [vmem:[%s2535_s5 + $0x238] sm:$0xff] %v585_v7  ;;  %v589_v9 = vld [vmem:[%s2530_s30 + $0x448] sm:$0xff]  ;;  %v591_v10 = vld [vmem:[%s2530_s30 + $0x450] sm:$0xff] }
  0x38   : > { %588 = vst [vmem:[%s2535_s5 + $0x240] sm:$0xff] %v587_v8  ;;  %590 = vst [vmem:[%s2535_s5 + $0x248] sm:$0xff] %v589_v9  ;;  %v593_v11 = vld [vmem:[%s2530_s30 + $0x458] sm:$0xff]  ;;  %v595_v12 = vld [vmem:[%s2530_s30 + $0x460] sm:$0xff] }
  0x39   : > { %592 = vst [vmem:[%s2535_s5 + $0x250] sm:$0xff] %v591_v10  ;;  %v597_v13 = vld [vmem:[%s2530_s30 + $0x468] sm:$0xff]  ;;  %594 = vst [vmem:[%s2535_s5 + $0x258] sm:$0xff] %v593_v11  ;;  %v599_v14 = vld [vmem:[%s2530_s30 + $0x470] sm:$0xff] }
  0x3a   : > { %596 = vst [vmem:[%s2535_s5 + $0x260] sm:$0xff] %v595_v12  ;;  %598 = vst [vmem:[%s2535_s5 + $0x268] sm:$0xff] %v597_v13  ;;  %v601_v15 = vld [vmem:[%s2530_s30 + $0x478] sm:$0xff]  ;;  %v603_v16 = vld [vmem:[%s2530_s30 + $0x500] sm:$0xff] }
  0x3b   : > { %600 = vst [vmem:[%s2535_s5 + $0x270] sm:$0xff] %v599_v14  ;;  %602 = vst [vmem:[%s2535_s5 + $0x278] sm:$0xff] %v601_v15  ;;  %v605_v17 = vld [vmem:[%s2530_s30 + $0x508] sm:$0xff]  ;;  %v607_v18 = vld [vmem:[%s2530_s30 + $0x510] sm:$0xff] }
  0x3c   : > { %604 = vst [vmem:[%s2535_s5 + $0x280] sm:$0xff] %v603_v16  ;;  %v609_v19 = vld [vmem:[%s2530_s30 + $0x518] sm:$0xff]  ;;  %606 = vst [vmem:[%s2535_s5 + $0x288] sm:$0xff] %v605_v17  ;;  %v611_v20 = vld [vmem:[%s2530_s30 + $0x520] sm:$0xff] }
  0x3d   : > { %608 = vst [vmem:[%s2535_s5 + $0x290] sm:$0xff] %v607_v18  ;;  %610 = vst [vmem:[%s2535_s5 + $0x298] sm:$0xff] %v609_v19  ;;  %v613_v21 = vld [vmem:[%s2530_s30 + $0x528] sm:$0xff]  ;;  %v615_v22 = vld [vmem:[%s2530_s30 + $0x530] sm:$0xff] }
  0x3e   : > { %612 = vst [vmem:[%s2535_s5 + $0x2a0] sm:$0xff] %v611_v20  ;;  %614 = vst [vmem:[%s2535_s5 + $0x2a8] sm:$0xff] %v613_v21  ;;  %v617_v23 = vld [vmem:[%s2530_s30 + $0x538] sm:$0xff]  ;;  %v619_v24 = vld [vmem:[%s2530_s30 + $0x540] sm:$0xff] }
  0x3f   : > { %616 = vst [vmem:[%s2535_s5 + $0x2b0] sm:$0xff] %v615_v22  ;;  %v621_v25 = vld [vmem:[%s2530_s30 + $0x548] sm:$0xff]  ;;  %618 = vst [vmem:[%s2535_s5 + $0x2b8] sm:$0xff] %v617_v23  ;;  %v623_v26 = vld [vmem:[%s2530_s30 + $0x550] sm:$0xff] }
  0x40   : > { %620 = vst [vmem:[%s2535_s5 + $0x2c0] sm:$0xff] %v619_v24  ;;  %622 = vst [vmem:[%s2535_s5 + $0x2c8] sm:$0xff] %v621_v25  ;;  %v625_v27 = vld [vmem:[%s2530_s30 + $0x558] sm:$0xff]  ;;  %v627_v28 = vld [vmem:[%s2530_s30 + $0x560] sm:$0xff] }
  0x41   : > { %624 = vst [vmem:[%s2535_s5 + $0x2d0] sm:$0xff] %v623_v26  ;;  %626 = vst [vmem:[%s2535_s5 + $0x2d8] sm:$0xff] %v625_v27  ;;  %v629_v29 = vld [vmem:[%s2530_s30 + $0x568] sm:$0xff]  ;;  %v631_v30 = vld [vmem:[%s2530_s30 + $0x570] sm:$0xff] }
  0x42   : > { %628 = vst [vmem:[%s2535_s5 + $0x2e0] sm:$0xff] %v627_v28  ;;  %v633_v31 = vld [vmem:[%s2530_s30 + $0x578] sm:$0xff]  ;;  %630 = vst [vmem:[%s2535_s5 + $0x2e8] sm:$0xff] %v629_v29  ;;  %v635_v32 = vld [vmem:[%s2530_s30 + $0x600] sm:$0xff] }
  0x43   : > { %632 = vst [vmem:[%s2535_s5 + $0x2f0] sm:$0xff] %v631_v30  ;;  %634 = vst [vmem:[%s2535_s5 + $0x2f8] sm:$0xff] %v633_v31  ;;  %v637_v33 = vld [vmem:[%s2530_s30 + $0x608] sm:$0xff]  ;;  %v639_v34 = vld [vmem:[%s2530_s30 + $0x610] sm:$0xff] }
  0x44   : > { %636 = vst [vmem:[%s2535_s5 + $0x300] sm:$0xff] %v635_v32  ;;  %638 = vst [vmem:[%s2535_s5 + $0x308] sm:$0xff] %v637_v33  ;;  %v641_v35 = vld [vmem:[%s2530_s30 + $0x618] sm:$0xff]  ;;  %v643_v36 = vld [vmem:[%s2530_s30 + $0x620] sm:$0xff] }
  0x45   : > { %640 = vst [vmem:[%s2535_s5 + $0x310] sm:$0xff] %v639_v34  ;;  %v645_v37 = vld [vmem:[%s2530_s30 + $0x628] sm:$0xff]  ;;  %642 = vst [vmem:[%s2535_s5 + $0x318] sm:$0xff] %v641_v35  ;;  %v647_v38 = vld [vmem:[%s2530_s30 + $0x630] sm:$0xff] }
  0x46   : > { %644 = vst [vmem:[%s2535_s5 + $0x320] sm:$0xff] %v643_v36  ;;  %646 = vst [vmem:[%s2535_s5 + $0x328] sm:$0xff] %v645_v37  ;;  %v649_v39 = vld [vmem:[%s2530_s30 + $0x638] sm:$0xff]  ;;  %v651_v40 = vld [vmem:[%s2530_s30 + $0x640] sm:$0xff] }
  0x47   : > { %648 = vst [vmem:[%s2535_s5 + $0x330] sm:$0xff] %v647_v38  ;;  %650 = vst [vmem:[%s2535_s5 + $0x338] sm:$0xff] %v649_v39  ;;  %v653_v41 = vld [vmem:[%s2530_s30 + $0x648] sm:$0xff]  ;;  %v655_v42 = vld [vmem:[%s2530_s30 + $0x650] sm:$0xff] }
  0x48   : > { %652 = vst [vmem:[%s2535_s5 + $0x340] sm:$0xff] %v651_v40  ;;  %v657_v43 = vld [vmem:[%s2530_s30 + $0x658] sm:$0xff]  ;;  %654 = vst [vmem:[%s2535_s5 + $0x348] sm:$0xff] %v653_v41  ;;  %v659_v44 = vld [vmem:[%s2530_s30 + $0x660] sm:$0xff] }
  0x49   : > { %656 = vst [vmem:[%s2535_s5 + $0x350] sm:$0xff] %v655_v42  ;;  %658 = vst [vmem:[%s2535_s5 + $0x358] sm:$0xff] %v657_v43  ;;  %v661_v45 = vld [vmem:[%s2530_s30 + $0x668] sm:$0xff]  ;;  %v663_v46 = vld [vmem:[%s2530_s30 + $0x670] sm:$0xff] }
  0x4a   : > { %660 = vst [vmem:[%s2535_s5 + $0x360] sm:$0xff] %v659_v44  ;;  %662 = vst [vmem:[%s2535_s5 + $0x368] sm:$0xff] %v661_v45  ;;  %v665_v47 = vld [vmem:[%s2530_s30 + $0x678] sm:$0xff]  ;;  %v667_v48 = vld [vmem:[%s2530_s30 + $0x700] sm:$0xff] }
  0x4b   : > { %664 = vst [vmem:[%s2535_s5 + $0x370] sm:$0xff] %v663_v46  ;;  %v669_v49 = vld [vmem:[%s2530_s30 + $0x708] sm:$0xff]  ;;  %666 = vst [vmem:[%s2535_s5 + $0x378] sm:$0xff] %v665_v47  ;;  %v671_v50 = vld [vmem:[%s2530_s30 + $0x710] sm:$0xff] }
  0x4c   : > { %668 = vst [vmem:[%s2535_s5 + $0x380] sm:$0xff] %v667_v48  ;;  %670 = vst [vmem:[%s2535_s5 + $0x388] sm:$0xff] %v669_v49  ;;  %v673_v51 = vld [vmem:[%s2530_s30 + $0x718] sm:$0xff]  ;;  %v675_v52 = vld [vmem:[%s2530_s30 + $0x720] sm:$0xff] }
  0x4d   : > { %672 = vst [vmem:[%s2535_s5 + $0x390] sm:$0xff] %v671_v50  ;;  %674 = vst [vmem:[%s2535_s5 + $0x398] sm:$0xff] %v673_v51  ;;  %v677_v53 = vld [vmem:[%s2530_s30 + $0x728] sm:$0xff]  ;;  %v679_v54 = vld [vmem:[%s2530_s30 + $0x730] sm:$0xff] }
  0x4e   : > { %676 = vst [vmem:[%s2535_s5 + $0x3a0] sm:$0xff] %v675_v52  ;;  %v681_v55 = vld [vmem:[%s2530_s30 + $0x738] sm:$0xff]  ;;  %678 = vst [vmem:[%s2535_s5 + $0x3a8] sm:$0xff] %v677_v53  ;;  %v683_v56 = vld [vmem:[%s2530_s30 + $0x740] sm:$0xff] }
  0x4f   : > { %680 = vst [vmem:[%s2535_s5 + $0x3b0] sm:$0xff] %v679_v54  ;;  %682 = vst [vmem:[%s2535_s5 + $0x3b8] sm:$0xff] %v681_v55  ;;  %v685_v57 = vld [vmem:[%s2530_s30 + $0x748] sm:$0xff]  ;;  %v687_v58 = vld [vmem:[%s2530_s30 + $0x750] sm:$0xff] }
  0x50   : > { %684 = vst [vmem:[%s2535_s5 + $0x3c0] sm:$0xff] %v683_v56  ;;  %686 = vst [vmem:[%s2535_s5 + $0x3c8] sm:$0xff] %v685_v57  ;;  %v689_v59 = vld [vmem:[%s2530_s30 + $0x758] sm:$0xff]  ;;  %v691_v60 = vld [vmem:[%s2530_s30 + $0x760] sm:$0xff] }
  0x51   : > { %688 = vst [vmem:[%s2535_s5 + $0x3d0] sm:$0xff] %v687_v58  ;;  %v693_v61 = vld [vmem:[%s2530_s30 + $0x768] sm:$0xff]  ;;  %690 = vst [vmem:[%s2535_s5 + $0x3d8] sm:$0xff] %v689_v59  ;;  %v695_v62 = vld [vmem:[%s2530_s30 + $0x770] sm:$0xff] }
  0x52   : > { %692 = vst [vmem:[%s2535_s5 + $0x3e0] sm:$0xff] %v691_v60  ;;  %694 = vst [vmem:[%s2535_s5 + $0x3e8] sm:$0xff] %v693_v61  ;;  %v697_v63 = vld [vmem:[%s2530_s30 + $0x778] sm:$0xff] }
  0x53   : > { %696 = vst [vmem:[%s2535_s5 + $0x3f0] sm:$0xff] %v695_v62  ;;  %698 = vst [vmem:[%s2535_s5 + $0x3f8] sm:$0xff] %v697_v63 }
  0x54 PF: > { %704 = sbr.rel (!%p2518_p3) target bundleno = 96 (0x60), region = 66  ;;  %s706_s6 = sand.u32 (%p2518_p3), 1, %s2449_s18  }
  0x55   : > { %s1984_s7 = sshll.u32 (%p2518_p3), %s2453_s19, 3  ;;  %s1983_s8 = sshll.u32 (%p2518_p3), %s706_s6, 7 }
  0x56   : > { %s2797_s11 = scalar_lea.vmem (%p2518_p3), %s3097_s2, %s1984_s7  ;;  %s708_s12 = scalar_lea.vmem (%p2518_p3), [#allocation4], %s1983_s8 }
  0x57   : > { %v768_v0 = vld [vmem:[%s2797_s11] sm:$0xff] (%p2518_p3)  ;;  %v770_v1 = vld [vmem:[%s2797_s11 + $0x10] sm:$0xff] (%p2518_p3) }
  0x58   : > { %v772_v2 = vld [vmem:[%s2797_s11 + $0x20] sm:$0xff] (%p2518_p3)  ;;  %769 = vst [vmem:[%s708_s12] sm:$0xff] (%p2518_p3), %v768_v0  ;;  %771 = vst [vmem:[%s708_s12 + $0x8] sm:$0xff] (%p2518_p3), %v770_v1  ;;  %v774_v3 = vld [vmem:[%s2797_s11 + $0x30] sm:$0xff] (%p2518_p3) }
  0x59   : > { %773 = vst [vmem:[%s708_s12 + $0x10] sm:$0xff] (%p2518_p3), %v772_v2  ;;  %v776_v4 = vld [vmem:[%s2797_s11 + $0x40] sm:$0xff] (%p2518_p3)  ;;  %v778_v5 = vld [vmem:[%s2797_s11 + $0x50] sm:$0xff] (%p2518_p3)  ;;  %775 = vst [vmem:[%s708_s12 + $0x18] sm:$0xff] (%p2518_p3), %v774_v3 }
  0x5a   : > { %777 = vst [vmem:[%s708_s12 + $0x20] sm:$0xff] (%p2518_p3), %v776_v4  ;;  %779 = vst [vmem:[%s708_s12 + $0x28] sm:$0xff] (%p2518_p3), %v778_v5  ;;  %v780_v6 = vld [vmem:[%s2797_s11 + $0x60] sm:$0xff] (%p2518_p3)  ;;  %v782_v7 = vld [vmem:[%s2797_s11 + $0x70] sm:$0xff] (%p2518_p3) }
  0x5b   : > { %v784_v8 = vld [vmem:[%s2797_s11 + $0x80] sm:$0xff]  ;;  %781 = vst [vmem:[%s708_s12 + $0x30] sm:$0xff] %v780_v6  ;;  %783 = vst [vmem:[%s708_s12 + $0x38] sm:$0xff] %v782_v7  ;;  %v786_v9 = vld [vmem:[%s2797_s11 + $0x90] sm:$0xff] }
  0x5c   : > { %785 = vst [vmem:[%s708_s12 + $0x40] sm:$0xff] %v784_v8  ;;  %v788_v10 = vld [vmem:[%s2797_s11 + $0xa0] sm:$0xff]  ;;  %v790_v11 = vld [vmem:[%s2797_s11 + $0xb0] sm:$0xff]  ;;  %787 = vst [vmem:[%s708_s12 + $0x48] sm:$0xff] %v786_v9 }
  0x5d   : > { %789 = vst [vmem:[%s708_s12 + $0x50] sm:$0xff] %v788_v10  ;;  %791 = vst [vmem:[%s708_s12 + $0x58] sm:$0xff] %v790_v11  ;;  %v792_v12 = vld [vmem:[%s2797_s11 + $0xc0] sm:$0xff]  ;;  %v794_v13 = vld [vmem:[%s2797_s11 + $0xd0] sm:$0xff] }
  0x5e   : > { %v796_v14 = vld [vmem:[%s2797_s11 + $0xe0] sm:$0xff]  ;;  %793 = vst [vmem:[%s708_s12 + $0x60] sm:$0xff] %v792_v12  ;;  %795 = vst [vmem:[%s708_s12 + $0x68] sm:$0xff] %v794_v13  ;;  %v798_v15 = vld [vmem:[%s2797_s11 + $0xf0] sm:$0xff] }
  0x5f   : > { %797 = vst [vmem:[%s708_s12 + $0x70] sm:$0xff] %v796_v14  ;;  %799 = vst [vmem:[%s708_s12 + $0x78] sm:$0xff] %v798_v15 }
  0x60 PF: > { %p1985_p5 = scmp.ge.s32.totalorder %s2453_s19, 1  ;;  %p804_p6 = scmp.lt.s32.totalorder %s2453_s19, 3 }
  0x62   : > { %p805_p7 = pnand %p1985_p5, %p804_p6 }
  0x63   : > { %s811_s13 = sand.u32 (!%p805_p7), 1, %s2445_s17   ;;  %p1988_p8 = scmp.ne.s32.totalorder (!%p805_p7), %s2504_s0, 0 }
  0x64   : > { %808 = sbr.rel (%p805_p7) target bundleno = 951 (0x3b7), region = 104  ;;  %s1986_s14 = sshll.u32 (!%p805_p7), %s811_s13, 10 }
  0x65   : > { %s1987_s15 = sshll.u32 (!%p805_p7), %s811_s13, 7  ;;  %s2818_s16 = scalar_lea.vmem (!%p805_p7), [#allocation3], %s1986_s14 }
  0x66   : > { %s2820_s21 = scalar_lea.vmem (!%p805_p7), [#allocation4], %s1987_s15 }
  0x6b   : > { %846 = sbr.rel (%p1988_p8) target bundleno = 114 (0x72), region = 116  ;;  %v2455_v16 = vmov (!%p1988_p8), 0.0  }
  0x6c   : > { %847 = vst [vmem:[#allocation5] sm:$0xff] (!%p1988_p8), %v2455_v16 }
  0x72 PF: > { %v865_v17 = vld [vmem:[%s2818_s16 + $0x80] sm:$0xff]  ;;  %v866_v19 = vld [vmem:[%s2818_s16 + $0x88] sm:$0xff]  ;;  %v867_v21 = vld [vmem:[%s2818_s16 + $0x90] sm:$0xff]  ;;  %s848_s17 = sld [smem:[#allocation2]]  ;;  %vm1800_vm0 = vcmask 1041409   ;;  %vm2457_vm1 = vmmov 0  }
  0x73   : > { %v849_v18 = vld [vmem:[%s2818_s16] sm:$0xff]  ;;  %1009 = vxpose.xlu1.b32.start [1/16] (narrow) %v865_v17, 64  ;;  %v850_v20 = vld [vmem:[%s2818_s16 + $0x8] sm:$0xff]  ;;  %v851_v22 = vld [vmem:[%s2818_s16 + $0x10] sm:$0xff]  ;;  %vm1802_vm2 = vcmask 1042434   ;;  %vm1804_vm3 = vcmask 1043459  }
  0x74   : > { %977 = vxpose.xlu0.b32.start [1/16] (narrow) %v849_v18, 64  ;;  %v868_v23 = vld [vmem:[%s2818_s16 + $0x98] sm:$0xff]  ;;  %v869_v25 = vld [vmem:[%s2818_s16 + $0xa0] sm:$0xff]  ;;  %v870_v27 = vld [vmem:[%s2818_s16 + $0xa8] sm:$0xff]  ;;  %vm1806_vm4 = vcmask 1044484   ;;  %vm1808_vm5 = vcmask 1045509  }
  0x75   : > { %v852_v24 = vld [vmem:[%s2818_s16 + $0x18] sm:$0xff]  ;;  %v853_v26 = vld [vmem:[%s2818_s16 + $0x20] sm:$0xff]  ;;  %v854_v28 = vld [vmem:[%s2818_s16 + $0x28] sm:$0xff]  ;;  %vm1810_vm6 = vcmask 1046534   ;;  %vm1812_vm7 = vcmask 1047559   ;;  %p1989_p9 = scmp.ne.s32.totalorder %s2504_s0, 1 }
  0x76   : > { %v871_v29 = vld [vmem:[%s2818_s16 + $0xb0] sm:$0xff]  ;;  %v872_v31 = vld [vmem:[%s2818_s16 + $0xb8] sm:$0xff]  ;;  %v873_v33 = vld [vmem:[%s2818_s16 + $0xc0] sm:$0xff] }
  0x77   : > { %1010 = vxpose.xlu1.b32.cont [2/16] (narrow) %v866_v19, 64  ;;  %v855_v30 = vld [vmem:[%s2818_s16 + $0x30] sm:$0xff]  ;;  %v856_v32 = vld [vmem:[%s2818_s16 + $0x38] sm:$0xff]  ;;  %v857_v34 = vld [vmem:[%s2818_s16 + $0x40] sm:$0xff] }
  0x78   : > { %978 = vxpose.xlu0.b32.cont [2/16] (narrow) %v850_v20, 64  ;;  %v874_v35 = vld [vmem:[%s2818_s16 + $0xc8] sm:$0xff]  ;;  %v875_v37 = vld [vmem:[%s2818_s16 + $0xd0] sm:$0xff]  ;;  %v876_v39 = vld [vmem:[%s2818_s16 + $0xd8] sm:$0xff]  ;;  %v2875_v5 = vstv %s848_s17 }
  0x79   : > { %v858_v36 = vld [vmem:[%s2818_s16 + $0x48] sm:$0xff]  ;;  %v859_v38 = vld [vmem:[%s2818_s16 + $0x50] sm:$0xff]  ;;  %v860_v40 = vld [vmem:[%s2818_s16 + $0x58] sm:$0xff]  ;;  %2109 = vrcp.f32 %v2875_v5 }
  0x7a   : > { %v877_v41 = vld [vmem:[%s2818_s16 + $0xe0] sm:$0xff]  ;;  %v878_v43 = vld [vmem:[%s2818_s16 + $0xe8] sm:$0xff]  ;;  %v879_v45 = vld [vmem:[%s2818_s16 + $0xf0] sm:$0xff] }
  0x7b   : > { %1011 = vxpose.xlu1.b32.cont [3/16] (narrow) %v867_v21, 64  ;;  %v861_v42 = vld [vmem:[%s2818_s16 + $0x60] sm:$0xff]  ;;  %v862_v44 = vld [vmem:[%s2818_s16 + $0x68] sm:$0xff]  ;;  %v863_v46 = vld [vmem:[%s2818_s16 + $0x70] sm:$0xff] }
  0x7c   : > { %979 = vxpose.xlu0.b32.cont [3/16] (narrow) %v851_v22, 64  ;;  %v880_v47 = vld [vmem:[%s2818_s16 + $0xf8] sm:$0xff]  ;;  %v897_v49 = vld [vmem:[%s2818_s16 + $0x180] sm:$0xff]  ;;  %v898_v51 = vld [vmem:[%s2818_s16 + $0x188] sm:$0xff] }
  0x7d   : > { %v864_v48 = vld [vmem:[%s2818_s16 + $0x78] sm:$0xff]  ;;  %v881_v50 = vld [vmem:[%s2818_s16 + $0x100] sm:$0xff]  ;;  %v882_v52 = vld [vmem:[%s2818_s16 + $0x108] sm:$0xff] }
  0x7e   : > { %v899_v53 = vld [vmem:[%s2818_s16 + $0x190] sm:$0xff]  ;;  %v900_v55 = vld [vmem:[%s2818_s16 + $0x198] sm:$0xff]  ;;  %v901_v57 = vld [vmem:[%s2818_s16 + $0x1a0] sm:$0xff] }
  0x7f   : > { %1012 = vxpose.xlu1.b32.cont [4/16] (narrow) %v868_v23, 64  ;;  %v883_v54 = vld [vmem:[%s2818_s16 + $0x110] sm:$0xff]  ;;  %v884_v56 = vld [vmem:[%s2818_s16 + $0x118] sm:$0xff]  ;;  %v885_v58 = vld [vmem:[%s2818_s16 + $0x120] sm:$0xff] }
  0x80   : > { %980 = vxpose.xlu0.b32.cont [4/16] (narrow) %v852_v24, 64  ;;  %v902_v59 = vld [vmem:[%s2818_s16 + $0x1a8] sm:$0xff]  ;;  %v903_v61 = vld [vmem:[%s2818_s16 + $0x1b0] sm:$0xff]  ;;  %v904_v63 = vld [vmem:[%s2818_s16 + $0x1b8] sm:$0xff] }
  0x81   : > { %v886_v60 = vld [vmem:[%s2818_s16 + $0x128] sm:$0xff]  ;;  %v887_v62 = vld [vmem:[%s2818_s16 + $0x130] sm:$0xff]  ;;  %v888_v0 = vld [vmem:[%s2818_s16 + $0x138] sm:$0xff] }
  0x82   : > { %v905_v1 = vld [vmem:[%s2818_s16 + $0x1c0] sm:$0xff]  ;;  %v906_v3 = vld [vmem:[%s2818_s16 + $0x1c8] sm:$0xff]  ;;  %v907_v6 = vld [vmem:[%s2818_s16 + $0x1d0] sm:$0xff] }
  0x83   : > { %1013 = vxpose.xlu1.b32.cont [5/16] (narrow) %v869_v25, 64  ;;  %v889_v2 = vld [vmem:[%s2818_s16 + $0x140] sm:$0xff]  ;;  %v890_v4 = vld [vmem:[%s2818_s16 + $0x148] sm:$0xff]  ;;  %v891_v7 = vld [vmem:[%s2818_s16 + $0x150] sm:$0xff]  ;;  %v2110_v12 = vpop.eup %2109 }
  0x84   : > { %981 = vxpose.xlu0.b32.cont [5/16] (narrow) %v853_v26, 64  ;;  %v908_v8 = vld [vmem:[%s2818_s16 + $0x1d8] sm:$0xff]  ;;  %v909_v10 = vld [vmem:[%s2818_s16 + $0x1e0] sm:$0xff]  ;;  %2072 = vpush %v2110_v12  ;;  %v910_v13 = vld [vmem:[%s2818_s16 + $0x1e8] sm:$0xff] }
  0x85   : > { %v892_v9 = vld [vmem:[%s2818_s16 + $0x158] sm:$0xff]  ;;  %v893_v11 = vld [vmem:[%s2818_s16 + $0x160] sm:$0xff]  ;;  %v894_v14 = vld [vmem:[%s2818_s16 + $0x168] sm:$0xff] }
  0x86   : > { %v911_v15 = vld [vmem:[%s2818_s16 + $0x1f0] sm:$0xff]  ;;  %v912_v17 = vld [vmem:[%s2818_s16 + $0x1f8] sm:$0xff]  ;;  %v929_v19 = vld [vmem:[%s2818_s16 + $0x280] sm:$0xff] }
  0x87   : > { %1014 = vxpose.xlu1.b32.cont [6/16] (narrow) %v870_v27, 64  ;;  %v895_v16 = vld [vmem:[%s2818_s16 + $0x170] sm:$0xff]  ;;  %v896_v18 = vld [vmem:[%s2818_s16 + $0x178] sm:$0xff]  ;;  %v913_v20 = vld [vmem:[%s2818_s16 + $0x200] sm:$0xff] }
  0x88   : > { %982 = vxpose.xlu0.b32.cont [6/16] (narrow) %v854_v28, 64  ;;  %v930_v23 = vld [vmem:[%s2818_s16 + $0x288] sm:$0xff] }
  0x89   : > { %v914_v24 = vld [vmem:[%s2818_s16 + $0x208] sm:$0xff] }
  0x8b   : > { %1015 = vxpose.xlu1.b32.cont [7/16] (narrow) %v871_v29, 64  ;;  %v931_v29 = vld [vmem:[%s2818_s16 + $0x290] sm:$0xff] }
  0x8c   : > { %983 = vxpose.xlu0.b32.cont [7/16] (narrow) %v855_v30, 64  ;;  %v915_v30 = vld [vmem:[%s2818_s16 + $0x210] sm:$0xff] }
  0x8f   : > { %1016 = vxpose.xlu1.b32.cont [8/16] (narrow) %v872_v31, 64 }
  0x90   : > { %984 = vxpose.xlu0.b32.cont [8/16] (narrow) %v856_v32, 64 }
  0x93   : > { %1017 = vxpose.xlu1.b32.cont [9/16] (narrow) %v873_v33, 64 }
  0x94   : > { %985 = vxpose.xlu0.b32.cont [9/16] (narrow) %v857_v34, 64 }
  0x97   : > { %1018 = vxpose.xlu1.b32.cont [10/16] (narrow) %v874_v35, 64  ;;  %v932_v35 = vld [vmem:[%s2818_s16 + $0x298] sm:$0xff] }
  0x98   : > { %986 = vxpose.xlu0.b32.cont [10/16] (narrow) %v858_v36, 64  ;;  %v916_v36 = vld [vmem:[%s2818_s16 + $0x218] sm:$0xff] }
  0x9b   : > { %1019 = vxpose.xlu1.b32.cont [11/16] (narrow) %v875_v37, 64 }
  0x9c   : > { %987 = vxpose.xlu0.b32.cont [11/16] (narrow) %v859_v38, 64 }
  0x9f   : > { %1020 = vxpose.xlu1.b32.cont [12/16] (narrow) %v876_v39, 64 }
  0xa0   : > { %988 = vxpose.xlu0.b32.cont [12/16] (narrow) %v860_v40, 64 }
  0xa3   : > { %1021 = vxpose.xlu1.b32.cont [13/16] (narrow) %v877_v41, 64 }
  0xa4   : > { %989 = vxpose.xlu0.b32.cont [13/16] (narrow) %v861_v42, 64  ;;  %v933_v42 = vld [vmem:[%s2818_s16 + $0x2a0] sm:$0xff] }
  0xa7   : > { %1022 = vxpose.xlu1.b32.cont [14/16] (narrow) %v878_v43, 64  ;;  %v917_v43 = vld [vmem:[%s2818_s16 + $0x220] sm:$0xff] }
  0xa8   : > { %990 = vxpose.xlu0.b32.cont [14/16] (narrow) %v862_v44, 64 }
  0xab   : > { %1023 = vxpose.xlu1.b32.cont [15/16] (narrow) %v879_v45, 64 }
  0xac   : > { %991 = vxpose.xlu0.b32.cont [15/16] (narrow) %v863_v46, 64 }
  0xaf   : > { %1024 = vxpose.xlu1.b32.end [16/16] (narrow) %v880_v47, 64 }
  0xb0   : > { %992 = vxpose.xlu0.b32.end [16/16] (narrow) %v864_v48, 64 }
  0xb3   : > { %1073 = vxpose.xlu1.b32.start [1/16] (narrow) %v897_v49, 64 }
  0xb4   : > { %1041 = vxpose.xlu0.b32.start [1/16] (narrow) %v881_v50, 64 }
  0xb5   : > { %s2073_s19 = spop %2072 }
  0xb7   : > { %1074 = vxpose.xlu1.b32.cont [2/16] (narrow) %v898_v51, 64 }
  0xb8   : > { %1042 = vxpose.xlu0.b32.cont [2/16] (narrow) %v882_v52, 64 }
  0xbb   : > { %1075 = vxpose.xlu1.b32.cont [3/16] (narrow) %v899_v53, 64  ;;  %v934_v53 = vld [vmem:[%s2818_s16 + $0x2a8] sm:$0xff] }
  0xbc   : > { %1043 = vxpose.xlu0.b32.cont [3/16] (narrow) %v883_v54, 64  ;;  %v918_v54 = vld [vmem:[%s2818_s16 + $0x228] sm:$0xff] }
  0xbf   : > { %1076 = vxpose.xlu1.b32.cont [4/16] (narrow) %v900_v55, 64 }
  0xc0   : > { %1044 = vxpose.xlu0.b32.cont [4/16] (narrow) %v884_v56, 64 }
  0xc3   : > { %1077 = vxpose.xlu1.b32.cont [5/16] (narrow) %v901_v57, 64 }
  0xc4   : > { %1045 = vxpose.xlu0.b32.cont [5/16] (narrow) %v885_v58, 64 }
  0xc7   : > { %1078 = vxpose.xlu1.b32.cont [6/16] (narrow) %v902_v59, 64 }
  0xc8   : > { %1046 = vxpose.xlu0.b32.cont [6/16] (narrow) %v886_v60, 64 }
  0xcb   : > { %1079 = vxpose.xlu1.b32.cont [7/16] (narrow) %v903_v61, 64 }
  0xcc   : > { %1047 = vxpose.xlu0.b32.cont [7/16] (narrow) %v887_v62, 64 }
  0xcf   : > { %1080 = vxpose.xlu1.b32.cont [8/16] (narrow) %v904_v63, 64 }
  0xd0   : > { %1048 = vxpose.xlu0.b32.cont [8/16] (narrow) %v888_v0, 64 }
  0xd3   : > { %1081 = vxpose.xlu1.b32.cont [9/16] (narrow) %v905_v1, 64 }
  0xd4   : > { %1049 = vxpose.xlu0.b32.cont [9/16] (narrow) %v889_v2, 64 }
  0xd7   : > { %1082 = vxpose.xlu1.b32.cont [10/16] (narrow) %v906_v3, 64  ;;  %v935_v3 = vld [vmem:[%s2818_s16 + $0x2b0] sm:$0xff] }
  0xd8   : > { %1050 = vxpose.xlu0.b32.cont [10/16] (narrow) %v890_v4, 64  ;;  %v919_v4 = vld [vmem:[%s2818_s16 + $0x230] sm:$0xff] }
  0xdb   : > { %1083 = vxpose.xlu1.b32.cont [11/16] (narrow) %v907_v6, 64 }
  0xdc   : > { %1051 = vxpose.xlu0.b32.cont [11/16] (narrow) %v891_v7, 64 }
  0xdf   : > { %1084 = vxpose.xlu1.b32.cont [12/16] (narrow) %v908_v8, 64 }
  0xe0   : > { %1052 = vxpose.xlu0.b32.cont [12/16] (narrow) %v892_v9, 64 }
  0xe3   : > { %1085 = vxpose.xlu1.b32.cont [13/16] (narrow) %v909_v10, 64 }
  0xe4   : > { %1053 = vxpose.xlu0.b32.cont [13/16] (narrow) %v893_v11, 64 }
  0xe7   : > { %1086 = vxpose.xlu1.b32.cont [14/16] (narrow) %v910_v13, 64 }
  0xe8   : > { %1054 = vxpose.xlu0.b32.cont [14/16] (narrow) %v894_v14, 64 }
  0xeb   : > { %1087 = vxpose.xlu1.b32.cont [15/16] (narrow) %v911_v15, 64 }
  0xec   : > { %1055 = vxpose.xlu0.b32.cont [15/16] (narrow) %v895_v16, 64 }
  0xef   : > { %1088 = vxpose.xlu1.b32.end [16/16] (narrow) %v912_v17, 64 }
  0xf0   : > { %1056 = vxpose.xlu0.b32.end [16/16] (narrow) %v896_v18, 64  ;;  %v936_v18 = vld [vmem:[%s2818_s16 + $0x2b8] sm:$0xff] }
  0xf3   : > { %1137 = vxpose.xlu1.b32.start [1/16] (narrow) %v929_v19, 64  ;;  %v1025_v22 = vpop.trf.xlu1  ;;  %v920_v19 = vld [vmem:[%s2818_s16 + $0x238] sm:$0xff] }
  0xf4   : > { %1105 = vxpose.xlu0.b32.start [1/16] (narrow) %v913_v20, 64  ;;  %v993_v21 = vpop.trf.xlu0  ;;  %v1241_v26 = vmax.f32 %v1025_v22, 1e-06 }
  0xf5   : > { %v1233_v25 = vmax.f32 %v993_v21, 1e-06 }
  0xf7   : > { %2111 = vlog2.f32 %v1233_v25  ;;  %1138 = vxpose.xlu1.b32.cont [2/16] (narrow) %v930_v23, 64  ;;  %v1026_v28 = vpop.trf.xlu1 }
  0xf8   : > { %1106 = vxpose.xlu0.b32.cont [2/16] (narrow) %v914_v24, 64  ;;  %2113 = vlog2.f32 %v1241_v26  ;;  %v994_v27 = vpop.trf.xlu0  ;;  %v1242_v32 = vmax.f32 %v1026_v28, 1e-06 }
  0xf9   : > { %v1234_v31 = vmax.f32 %v994_v27, 1e-06 }
  0xfb   : > { %2115 = vlog2.f32 %v1234_v31  ;;  %1139 = vxpose.xlu1.b32.cont [3/16] (narrow) %v931_v29, 64  ;;  %v1027_v34 = vpop.trf.xlu1  ;;  %v937_v31 = vld [vmem:[%s2818_s16 + $0x2c0] sm:$0xff] }
  0xfc   : > { %1107 = vxpose.xlu0.b32.cont [3/16] (narrow) %v915_v30, 64  ;;  %2117 = vlog2.f32 %v1242_v32  ;;  %v995_v33 = vpop.trf.xlu0  ;;  %v1243_v38 = vmax.f32 %v1027_v34, 1e-06  ;;  %v921_v32 = vld [vmem:[%s2818_s16 + $0x240] sm:$0xff] }
  0xfd   : > { %v1235_v37 = vmax.f32 %v995_v33, 1e-06 }
  0xff   : > { %2119 = vlog2.f32 %v1235_v37  ;;  %1140 = vxpose.xlu1.b32.cont [4/16] (narrow) %v932_v35, 64  ;;  %v1028_v40 = vpop.trf.xlu1 }
 0x100   : > { %1108 = vxpose.xlu0.b32.cont [4/16] (narrow) %v916_v36, 64  ;;  %2121 = vlog2.f32 %v1243_v38  ;;  %v996_v39 = vpop.trf.xlu0  ;;  %v1244_v45 = vmax.f32 %v1028_v40, 1e-06 }
 0x101   : > { %v2112_v41 = vpop.eup %2111  ;;  %v1236_v44 = vmax.f32 %v996_v39, 1e-06 }
 0x102   : > { %v2114_v46 = vpop.eup %2113  ;;  %v1298_v47 = vmul.f32 0.6931472, %v2112_v41 }
 0x103   : > { %v1314_v48 = vmul.f32 0.6931472, %v2114_v46  ;;  %2123 = vlog2.f32 %v1236_v44  ;;  %1141 = vxpose.xlu1.b32.cont [5/16] (narrow) %v933_v42, 64  ;;  %v1029_v51 = vpop.trf.xlu1  ;;  %v922_v46 = vld [vmem:[%s2818_s16 + $0x248] sm:$0xff] }
 0x104   : > { %1109 = vxpose.xlu0.b32.cont [5/16] (narrow) %v917_v43, 64  ;;  %v1426_v49 = vmul.f32 %v2875_v5, %v1298_v47  ;;  %2125 = vlog2.f32 %v1244_v45  ;;  %v997_v50 = vpop.trf.xlu0  ;;  %v1245_v60 = vmax.f32 %v1029_v51, 1e-06  ;;  %v938_v45 = vld [vmem:[%s2818_s16 + $0x2c8] sm:$0xff] }
 0x105   : > { %v2116_v52 = vpop.eup %2115  ;;  %v1434_v55 = vmul.f32 %v2875_v5, %v1314_v48  ;;  %v1237_v56 = vmax.f32 %v997_v50, 1e-06 }
 0x106   : > { %v2118_v57 = vpop.eup %2117  ;;  %v1490_v58 = vmul.f32 1.442695, %v1426_v49  ;;  %v1300_v59 = vmul.f32 0.6931472, %v2116_v52 }
 0x107   : > { %v1506_v61 = vmul.f32 1.442695, %v1434_v55  ;;  %v1316_v62 = vmul.f32 0.6931472, %v2118_v57  ;;  %2127 = vlog2.f32 %v1237_v56  ;;  %1142 = vxpose.xlu1.b32.cont [6/16] (narrow) %v934_v53, 64  ;;  %v1030_v1 = vpop.trf.xlu1 }
 0x108   : > { %1110 = vxpose.xlu0.b32.cont [6/16] (narrow) %v918_v54, 64  ;;  %2129 = vpow2.f32 %v1490_v58  ;;  %v1427_v63 = vmul.f32 %v2875_v5, %v1300_v59  ;;  %v998_v0 = vpop.trf.xlu0  ;;  %v1246_v11 = vmax.f32 %v1030_v1, 1e-06  ;;  %v939_v58 = vld [vmem:[%s2818_s16 + $0x2d0] sm:$0xff] }
 0x109   : > { %v2120_v2 = vpop.eup %2119  ;;  %2131 = vpow2.f32 %v1506_v61  ;;  %v1435_v6 = vmul.f32 %v2875_v5, %v1316_v62  ;;  %v1238_v7 = vmax.f32 %v998_v0, 1e-06  ;;  %v923_v59 = vld [vmem:[%s2818_s16 + $0x250] sm:$0xff] }
 0x10a   : > { %v2122_v8 = vpop.eup %2121  ;;  %v1492_v9 = vmul.f32 1.442695, %v1427_v63  ;;  %v1302_v10 = vmul.f32 0.6931472, %v2120_v2  ;;  %2133 = vlog2.f32 %v1245_v60 }
 0x10b   : > { %v1508_v12 = vmul.f32 1.442695, %v1435_v6  ;;  %v1318_v13 = vmul.f32 0.6931472, %v2122_v8  ;;  %2135 = vlog2.f32 %v1238_v7  ;;  %1143 = vxpose.xlu1.b32.cont [7/16] (narrow) %v935_v3, 64  ;;  %v1031_v16 = vpop.trf.xlu1 }
 0x10c   : > { %1111 = vxpose.xlu0.b32.cont [7/16] (narrow) %v919_v4, 64  ;;  %2137 = vpow2.f32 %v1492_v9  ;;  %v1428_v14 = vmul.f32 %v2875_v5, %v1302_v10  ;;  %v999_v15 = vpop.trf.xlu0  ;;  %v1247_v25 = vmax.f32 %v1031_v16, 1e-06  ;;  %v940_v9 = vld [vmem:[%s2818_s16 + $0x2d8] sm:$0xff] }
 0x10d   : > { %v2124_v17 = vpop.eup %2123  ;;  %2139 = vpow2.f32 %v1508_v12  ;;  %v1436_v20 = vmul.f32 %v2875_v5, %v1318_v13  ;;  %v1239_v21 = vmax.f32 %v999_v15, 1e-06  ;;  %v924_v10 = vld [vmem:[%s2818_s16 + $0x258] sm:$0xff] }
 0x10e   : > { %v2126_v22 = vpop.eup %2125  ;;  %v1494_v23 = vmul.f32 1.442695, %v1428_v14  ;;  %v1304_v24 = vmul.f32 0.6931472, %v2124_v17  ;;  %2141 = vlog2.f32 %v1246_v11 }
 0x10f   : > { %v1510_v26 = vmul.f32 1.442695, %v1436_v20  ;;  %v1320_v27 = vmul.f32 0.6931472, %v2126_v22  ;;  %2143 = vlog2.f32 %v1239_v21  ;;  %1144 = vxpose.xlu1.b32.cont [8/16] (narrow) %v936_v18, 64  ;;  %v1032_v35 = vpop.trf.xlu1  ;;  %v941_v22 = vld [vmem:[%s2818_s16 + $0x2e0] sm:$0xff] }
 0x110   : > { %1112 = vxpose.xlu0.b32.cont [8/16] (narrow) %v920_v19, 64  ;;  %2145 = vpow2.f32 %v1494_v23  ;;  %v1429_v28 = vmul.f32 %v2875_v5, %v1304_v24  ;;  %v1000_v29 = vpop.trf.xlu0  ;;  %v1248_v39 = vmax.f32 %v1032_v35, 1e-06  ;;  %v925_v23 = vld [vmem:[%s2818_s16 + $0x260] sm:$0xff] }
 0x111   : > { %v2128_v30 = vpop.eup %2127  ;;  %2147 = vpow2.f32 %v1510_v26  ;;  %v1437_v33 = vmul.f32 %v2875_v5, %v1320_v27  ;;  %v1240_v34 = vmax.f32 %v1000_v29, 1e-06 }
 0x112   : > { %v2130_v36 = vpop.eup %2129  ;;  %v1496_v37 = vmul.f32 1.442695, %v1429_v28  ;;  %v1306_v38 = vmul.f32 0.6931472, %v2128_v30  ;;  %2149 = vlog2.f32 %v1247_v25 }
 0x113   : > { %v2132_v40 = vpop.eup %2131  ;;  %v1512_v41 = vmul.f32 1.442695, %v1437_v33  ;;  %2151 = vlog2.f32 %v1240_v34  ;;  %1145 = vxpose.xlu1.b32.cont [9/16] (narrow) %v937_v31, 64  ;;  %v942_v31 = vld [vmem:[%s2818_s16 + $0x2e8] sm:$0xff] }
 0x114   : > { %v2134_v42 = vpop.eup %2133  ;;  %1113 = vxpose.xlu0.b32.cont [9/16] (narrow) %v921_v32, 64  ;;  %2153 = vpow2.f32 %v1496_v37  ;;  %v1430_v43 = vmul.f32 %v2875_v5, %v1306_v38  ;;  %v926_v32 = vld [vmem:[%s2818_s16 + $0x268] sm:$0xff]  ;;  %v943_v38 = vld [vmem:[%s2818_s16 + $0x2f0] sm:$0xff] }
 0x115   : > { %v2136_v44 = vpop.eup %2135  ;;  %2155 = vpow2.f32 %v1512_v41  ;;  %v1322_v47 = vmul.f32 0.6931472, %v2134_v42 }
 0x116   : > { %v2138_v48 = vpop.eup %2137  ;;  %v1498_v49 = vmul.f32 1.442695, %v1430_v43  ;;  %v1308_v50 = vmul.f32 0.6931472, %v2136_v44  ;;  %2157 = vlog2.f32 %v1248_v39  ;;  %v927_v39 = vld [vmem:[%s2818_s16 + $0x270] sm:$0xff]  ;;  %v944_v44 = vld [vmem:[%s2818_s16 + $0x2f8] sm:$0xff] }
 0x117   : > { %v2140_v51 = vpop.eup %2139  ;;  %v1618_v52 = vadd.f32 %v2138_v48, %v2130_v36  ;;  %v1438_v53 = vmul.f32 %v2875_v5, %v1322_v47  ;;  %1146 = vxpose.xlu1.b32.cont [10/16] (narrow) %v938_v45, 64  ;;  %v928_v45 = vld [vmem:[%s2818_s16 + $0x278] sm:$0xff] }
 0x118   : > { %v2142_v54 = vpop.eup %2141  ;;  %1114 = vxpose.xlu0.b32.cont [10/16] (narrow) %v922_v46, 64  ;;  %v1631_v55 = vadd.f32 %v2140_v51, %v2132_v40  ;;  %2159 = vpow2.f32 %v1498_v49  ;;  %v1431_v56 = vmul.f32 %v2875_v5, %v1308_v50  ;;  %v961_v50 = vld [vmem:[%s2818_s16 + $0x380] sm:$0xff] }
 0x119   : > { %v2144_v57 = vpop.eup %2143  ;;  %v1514_v60 = vmul.f32 1.442695, %v1438_v53  ;;  %v1324_v61 = vmul.f32 0.6931472, %v2142_v54  ;;  %v945_v51 = vld [vmem:[%s2818_s16 + $0x300] sm:$0xff] }
 0x11a   : > { %v2146_v62 = vpop.eup %2145  ;;  %v1500_v63 = vmul.f32 1.442695, %v1431_v56  ;;  %v1310_v0 = vmul.f32 0.6931472, %v2144_v57 }
 0x11b   : > { %v2148_v1 = vpop.eup %2147  ;;  %v1619_v2 = vadd.f32 %v2146_v62, %v1618_v52  ;;  %2161 = vpow2.f32 %v1514_v60  ;;  %v1439_v3 = vmul.f32 %v2875_v5, %v1324_v61  ;;  %1147 = vxpose.xlu1.b32.cont [11/16] (narrow) %v939_v58, 64 }
 0x11c   : > { %v2150_v4 = vpop.eup %2149  ;;  %1115 = vxpose.xlu0.b32.cont [11/16] (narrow) %v923_v59, 64  ;;  %v1632_v6 = vadd.f32 %v2148_v1, %v1631_v55  ;;  %2163 = vpow2.f32 %v1500_v63  ;;  %v1432_v7 = vmul.f32 %v2875_v5, %v1310_v0  ;;  %v962_v55 = vld [vmem:[%s2818_s16 + $0x388] sm:$0xff]  ;;  %v963_v1 = vld [vmem:[%s2818_s16 + $0x390] sm:$0xff] }
 0x11d   : > { %v2152_v8 = vpop.eup %2151  ;;  %v1516_v11 = vmul.f32 1.442695, %v1439_v3  ;;  %v1326_v12 = vmul.f32 0.6931472, %v2150_v4  ;;  %v946_v59 = vld [vmem:[%s2818_s16 + $0x308] sm:$0xff] }
 0x11e   : > { %v2154_v13 = vpop.eup %2153  ;;  %v1502_v14 = vmul.f32 1.442695, %v1432_v7  ;;  %v1312_v15 = vmul.f32 0.6931472, %v2152_v8 }
 0x11f   : > { %v2156_v16 = vpop.eup %2155  ;;  %v1620_v17 = vadd.f32 %v2154_v13, %v1619_v2  ;;  %2165 = vpow2.f32 %v1516_v11  ;;  %v1440_v18 = vmul.f32 %v2875_v5, %v1326_v12  ;;  %1148 = vxpose.xlu1.b32.cont [12/16] (narrow) %v940_v9, 64  ;;  %v964_v12 = vld [vmem:[%s2818_s16 + $0x398] sm:$0xff] }
 0x120   : > { %v2158_v19 = vpop.eup %2157  ;;  %1116 = vxpose.xlu0.b32.cont [12/16] (narrow) %v924_v10, 64  ;;  %v1633_v20 = vadd.f32 %v2156_v16, %v1632_v6  ;;  %2167 = vpow2.f32 %v1502_v14  ;;  %v1433_v21 = vmul.f32 %v2875_v5, %v1312_v15  ;;  %v947_v6 = vld [vmem:[%s2818_s16 + $0x310] sm:$0xff]  ;;  %v948_v16 = vld [vmem:[%s2818_s16 + $0x318] sm:$0xff] }
 0x121   : > { %v1518_v24 = vmul.f32 1.442695, %v1440_v18  ;;  %v1328_v25 = vmul.f32 0.6931472, %v2158_v19 }
 0x122   : > { %v2160_v26 = vpop.eup %2159  ;;  %v1504_v27 = vmul.f32 1.442695, %v1433_v21 }
 0x123   : > { %v1621_v28 = vadd.f32 %v2160_v26, %v1620_v17  ;;  %2169 = vpow2.f32 %v1518_v24  ;;  %v1441_v29 = vmul.f32 %v2875_v5, %v1328_v25  ;;  %1149 = vxpose.xlu1.b32.cont [13/16] (narrow) %v941_v22, 64  ;;  %v965_v25 = vld [vmem:[%s2818_s16 + $0x3a0] sm:$0xff] }
 0x124   : > { %1117 = vxpose.xlu0.b32.cont [13/16] (narrow) %v925_v23, 64  ;;  %2171 = vpow2.f32 %v1504_v27  ;;  %v949_v26 = vld [vmem:[%s2818_s16 + $0x320] sm:$0xff] }
 0x125   : > { %v2162_v30 = vpop.eup %2161  ;;  %v1520_v33 = vmul.f32 1.442695, %v1441_v29 }
 0x126   : > { %v2164_v34 = vpop.eup %2163  ;;  %v1634_v35 = vadd.f32 %v2162_v30, %v1633_v20 }
 0x127   : > { %v1622_v36 = vadd.f32 %v2164_v34, %v1621_v28  ;;  %2173 = vpow2.f32 %v1520_v33  ;;  %1150 = vxpose.xlu1.b32.cont [14/16] (narrow) %v942_v31, 64 }
 0x128   : > { %1118 = vxpose.xlu0.b32.cont [14/16] (narrow) %v926_v32, 64 }
 0x129   : > { %v2166_v37 = vpop.eup %2165 }
 0x12a   : > { %v2168_v40 = vpop.eup %2167  ;;  %v1635_v41 = vadd.f32 %v2166_v37, %v1634_v35  ;;  %v966_v37 = vld [vmem:[%s2818_s16 + $0x3a8] sm:$0xff] }
 0x12b   : > { %v1623_v42 = vadd.f32 %v2168_v40, %v1622_v36  ;;  %1151 = vxpose.xlu1.b32.cont [15/16] (narrow) %v943_v38, 64  ;;  %v950_v38 = vld [vmem:[%s2818_s16 + $0x328] sm:$0xff] }
 0x12c   : > { %1119 = vxpose.xlu0.b32.cont [15/16] (narrow) %v927_v39, 64 }
 0x12d   : > { %v2170_v43 = vpop.eup %2169 }
 0x12e   : > { %v2172_v46 = vpop.eup %2171  ;;  %v1636_v47 = vadd.f32 %v2170_v43, %v1635_v41 }
 0x12f   : > { %v1624_v48 = vadd.f32 %v2172_v46, %v1623_v42  ;;  %1152 = vxpose.xlu1.b32.end [16/16] (narrow) %v944_v44, 64 }
 0x130   : > { %1120 = vxpose.xlu0.b32.end [16/16] (narrow) %v928_v45, 64 }
 0x131   : > { %v2174_v49 = vpop.eup %2173  ;;  %v1625_v52 = vrot.slane %v1624_v48, 4 }
 0x132   : > { %v1637_v53 = vadd.f32 %v2174_v49, %v1636_v47 }
 0x133   : > { %v1626_v54 = vadd.f32 %v1625_v52, %v1624_v48  ;;  %1201 = vxpose.xlu1.b32.start [1/16] (narrow) %v961_v50, 64  ;;  %v1089_v58 = vpop.trf.xlu1  ;;  %v951_v52 = vld [vmem:[%s2818_s16 + $0x330] sm:$0xff] }
 0x134   : > { %1169 = vxpose.xlu0.b32.start [1/16] (narrow) %v945_v51, 64  ;;  %v1638_v56 = vrot.slane %v1637_v53, 4  ;;  %v1057_v57 = vpop.trf.xlu0  ;;  %v1257_v62 = vmax.f32 %v1089_v58, 1e-06  ;;  %v967_v51 = vld [vmem:[%s2818_s16 + $0x3b0] sm:$0xff] }
 0x135   : > { %v1627_v60 = vrot.slane %v1626_v54, 2  ;;  %v1249_v61 = vmax.f32 %v1057_v57, 1e-06 }
 0x136   : > { %v1639_v63 = vadd.f32 %v1638_v56, %v1637_v53 }
 0x137   : > { %v1628_v0 = vadd.f32 %v1627_v60, %v1626_v54  ;;  %2175 = vlog2.f32 %v1249_v61  ;;  %1202 = vxpose.xlu1.b32.cont [2/16] (narrow) %v962_v55, 64  ;;  %v1090_v4 = vpop.trf.xlu1 }
 0x138   : > { %1170 = vxpose.xlu0.b32.cont [2/16] (narrow) %v946_v59, 64  ;;  %v1640_v2 = vrot.slane %v1639_v63, 2  ;;  %2177 = vlog2.f32 %v1257_v62  ;;  %v1058_v3 = vpop.trf.xlu0  ;;  %v1258_v8 = vmax.f32 %v1090_v4, 1e-06 }
 0x139   : > { %v1250_v7 = vmax.f32 %v1058_v3, 1e-06  ;;  %v1629_v9 = vrot.slane %v1628_v0, 1 }
 0x13a   : > { %v1641_v10 = vadd.f32 %v1640_v2, %v1639_v63  ;;  %v2957_v2 = vstv %s2073_s19 }
 0x13b   : > { %2179 = vlog2.f32 %v1250_v7  ;;  %v1630_v11 = vadd.f32 %v1629_v9, %v1628_v0  ;;  %1203 = vxpose.xlu1.b32.cont [3/16] (narrow) %v963_v1, 64  ;;  %v1091_v14 = vpop.trf.xlu1  ;;  %v952_v7 = vld [vmem:[%s2818_s16 + $0x338] sm:$0xff] }
 0x13c   : > { %1171 = vxpose.xlu0.b32.cont [3/16] (narrow) %v947_v6, 64  ;;  %2181 = vlog2.f32 %v1258_v8  ;;  %v1059_v13 = vpop.trf.xlu0  ;;  %v1642_v15 = vrot.slane %v1641_v10, 1  ;;  %v1259_v18 = vmax.f32 %v1091_v14, 1e-06  ;;  %v968_v6 = vld [vmem:[%s2818_s16 + $0x3b8] sm:$0xff] }
 0x13d   : > { %v1251_v17 = vmax.f32 %v1059_v13, 1e-06  ;;  %v1723_v19 = vmul.f32 0.015625, %v1630_v11 }
 0x13e   : > { %v1643_v20 = vadd.f32 %v1642_v15, %v1641_v10 }
 0x13f   : > { %2183 = vlog2.f32 %v1251_v17  ;;  %1204 = vxpose.xlu1.b32.cont [4/16] (narrow) %v964_v12, 64  ;;  %v1092_v22 = vpop.trf.xlu1 }
 0x140   : > { %1172 = vxpose.xlu0.b32.cont [4/16] (narrow) %v948_v16, 64  ;;  %2185 = vlog2.f32 %v1259_v18  ;;  %v1060_v21 = vpop.trf.xlu0  ;;  %v1724_v23 = vmul.f32 0.015625, %v1643_v20  ;;  %v1260_v28 = vmax.f32 %v1092_v22, 1e-06  ;;  %v969_v22 = vld [vmem:[%s2818_s16 + $0x3c0] sm:$0xff] }
 0x141   : > { %v2176_v24 = vpop.eup %2175  ;;  %v1252_v27 = vmax.f32 %v1060_v21, 1e-06  ;;  %2187 = vlog2.f32 %v1723_v19 }
 0x142   : > { %v2178_v29 = vpop.eup %2177  ;;  %v1330_v30 = vmul.f32 0.6931472, %v2176_v24  ;;  %2189 = vlog2.f32 %v1724_v23  ;;  %v953_v23 = vld [vmem:[%s2818_s16 + $0x340] sm:$0xff] }
 0x143   : > { %v1346_v31 = vmul.f32 0.6931472, %v2178_v29  ;;  %2191 = vlog2.f32 %v1252_v27  ;;  %1205 = vxpose.xlu1.b32.cont [5/16] (narrow) %v965_v25, 64  ;;  %v1093_v34 = vpop.trf.xlu1 }
 0x144   : > { %v1442_v32 = vmul.f32 %v2875_v5, %v1330_v30  ;;  %1173 = vxpose.xlu0.b32.cont [5/16] (narrow) %v949_v26, 64  ;;  %2193 = vlog2.f32 %v1260_v28  ;;  %v1061_v33 = vpop.trf.xlu0  ;;  %v1261_v43 = vmax.f32 %v1093_v34, 1e-06 }
 0x145   : > { %v2180_v35 = vpop.eup %2179  ;;  %v1450_v36 = vmul.f32 %v2875_v5, %v1346_v31  ;;  %v1253_v39 = vmax.f32 %v1061_v33, 1e-06 }
 0x146   : > { %v2182_v40 = vpop.eup %2181  ;;  %v1522_v41 = vmul.f32 1.442695, %v1442_v32  ;;  %v1332_v42 = vmul.f32 0.6931472, %v2180_v35 }
 0x147   : > { %v1538_v44 = vmul.f32 1.442695, %v1450_v36  ;;  %v1348_v45 = vmul.f32 0.6931472, %v2182_v40  ;;  %2195 = vlog2.f32 %v1253_v39  ;;  %1206 = vxpose.xlu1.b32.cont [6/16] (narrow) %v966_v37, 64  ;;  %v1094_v48 = vpop.trf.xlu1  ;;  %v970_v37 = vld [vmem:[%s2818_s16 + $0x3c8] sm:$0xff] }
 0x148   : > { %2197 = vpow2.f32 %v1522_v41  ;;  %v1443_v46 = vmul.f32 %v2875_v5, %v1332_v42  ;;  %1174 = vxpose.xlu0.b32.cont [6/16] (narrow) %v950_v38, 64  ;;  %v1062_v47 = vpop.trf.xlu0  ;;  %v1262_v57 = vmax.f32 %v1094_v48, 1e-06  ;;  %v954_v38 = vld [vmem:[%s2818_s16 + $0x348] sm:$0xff] }
 0x149   : > { %v2184_v49 = vpop.eup %2183  ;;  %2199 = vpow2.f32 %v1538_v44  ;;  %v1451_v50 = vmul.f32 %v2875_v5, %v1348_v45  ;;  %v1254_v53 = vmax.f32 %v1062_v47, 1e-06 }
 0x14a   : > { %v2186_v54 = vpop.eup %2185  ;;  %v1524_v55 = vmul.f32 1.442695, %v1443_v46  ;;  %v1334_v56 = vmul.f32 0.6931472, %v2184_v49  ;;  %2201 = vlog2.f32 %v1261_v43 }
 0x14b   : > { %v2188_v58 = vpop.eup %2187  ;;  %v1540_v59 = vmul.f32 1.442695, %v1451_v50  ;;  %v1350_v60 = vmul.f32 0.6931472, %v2186_v54  ;;  %2203 = vlog2.f32 %v1254_v53  ;;  %1207 = vxpose.xlu1.b32.cont [7/16] (narrow) %v967_v51, 64  ;;  %v1095_v0 = vpop.trf.xlu1  ;;  %v955_v53 = vld [vmem:[%s2818_s16 + $0x350] sm:$0xff] }
 0x14c   : > { %v2190_v61 = vpop.eup %2189  ;;  %2205 = vpow2.f32 %v1524_v55  ;;  %v1444_v62 = vmul.f32 %v2875_v5, %v1334_v56  ;;  %1175 = vxpose.xlu0.b32.cont [7/16] (narrow) %v951_v52, 64  ;;  %v1063_v63 = vpop.trf.xlu0  ;;  %v1732_v1 = vmul.f32 0.6931472, %v2188_v58  ;;  %v1263_v9 = vmax.f32 %v1095_v0, 1e-06  ;;  %v971_v52 = vld [vmem:[%s2818_s16 + $0x3d0] sm:$0xff] }
 0x14d   : > { %v2192_v3 = vpop.eup %2191  ;;  %2207 = vpow2.f32 %v1540_v59  ;;  %v1452_v4 = vmul.f32 %v2875_v5, %v1350_v60  ;;  %v1255_v8 = vmax.f32 %v1063_v63, 1e-06  ;;  %v1734_v13 = vmul.f32 0.6931472, %v2190_v61 }
 0x14e   : > { %v2194_v10 = vpop.eup %2193  ;;  %v1526_v11 = vmul.f32 1.442695, %v1444_v62  ;;  %v1336_v12 = vmul.f32 0.6931472, %v2192_v3  ;;  %2209 = vlog2.f32 %v1262_v57  ;;  %v1751_v16 = vmul.f32 %v2957_v2, %v1732_v1  ;;  %v972_v3 = vld [vmem:[%s2818_s16 + $0x3d8] sm:$0xff] }
 0x14f   : > { %v1542_v14 = vmul.f32 1.442695, %v1452_v4  ;;  %v1352_v15 = vmul.f32 0.6931472, %v2194_v10  ;;  %2211 = vlog2.f32 %v1255_v8  ;;  %1208 = vxpose.xlu1.b32.cont [8/16] (narrow) %v968_v6, 64  ;;  %v1096_v19 = vpop.trf.xlu1  ;;  %v1752_v25 = vmul.f32 %v2957_v2, %v1734_v13  ;;  %v956_v4 = vld [vmem:[%s2818_s16 + $0x358] sm:$0xff] }
 0x150   : > { %2213 = vpow2.f32 %v1526_v11  ;;  %v1445_v17 = vmul.f32 %v2875_v5, %v1336_v12  ;;  %1176 = vxpose.xlu0.b32.cont [8/16] (narrow) %v952_v7, 64  ;;  %v1064_v18 = vpop.trf.xlu0  ;;  %v1264_v29 = vmax.f32 %v1096_v19, 1e-06  ;;  %v1759_v32 = vmul.f32 1.442695, %v1751_v16  ;;  %v957_v19 = vld [vmem:[%s2818_s16 + $0x360] sm:$0xff] }
 0x151   : > { %v2196_v20 = vpop.eup %2195  ;;  %2215 = vpow2.f32 %v1542_v14  ;;  %v1453_v21 = vmul.f32 %v2875_v5, %v1352_v15  ;;  %v1256_v24 = vmax.f32 %v1064_v18, 1e-06  ;;  %v1761_v39 = vmul.f32 1.442695, %v1752_v25  ;;  %v973_v15 = vld [vmem:[%s2818_s16 + $0x3e0] sm:$0xff] }
 0x152   : > { %v2198_v26 = vpop.eup %2197  ;;  %v1528_v27 = vmul.f32 1.442695, %v1445_v17  ;;  %v1338_v28 = vmul.f32 0.6931472, %v2196_v20  ;;  %2217 = vlog2.f32 %v1263_v9 }
 0x153   : > { %v2200_v30 = vpop.eup %2199  ;;  %v1544_v31 = vmul.f32 1.442695, %v1453_v21  ;;  %2219 = vlog2.f32 %v1256_v24  ;;  %1209 = vxpose.xlu1.b32.cont [9/16] (narrow) %v969_v22, 64  ;;  %v1776_v22 = vld [vmem:[%s2820_s21] sm:$0xff] }
 0x154   : > { %v2202_v33 = vpop.eup %2201  ;;  %2221 = vpow2.f32 %v1528_v27  ;;  %v1446_v34 = vmul.f32 %v2875_v5, %v1338_v28  ;;  %1177 = vxpose.xlu0.b32.cont [9/16] (narrow) %v953_v23, 64  ;;  %v1777_v23 = vld [vmem:[%s2820_s21 + $0x8] sm:$0xff] }
 0x155   : > { %v2204_v35 = vpop.eup %2203  ;;  %2223 = vpow2.f32 %v1544_v31  ;;  %v1354_v36 = vmul.f32 0.6931472, %v2202_v33  ;;  %v2049_v27 = vpack.c.bf16 %v1777_v23, %v1776_v22  ;;  %v974_v31 = vld [vmem:[%s2818_s16 + $0x3e8] sm:$0xff]  ;;  %v2456_v33 = vmov 0.0|0.0   ;;  %v1787_v22 = vld [vmem:[%s2820_s21 + $0x58] sm:$0xff] }
 0x156   : > { %v2206_v40 = vpop.eup %2205  ;;  %v1530_v41 = vmul.f32 1.442695, %v1446_v34  ;;  %v1340_v42 = vmul.f32 0.6931472, %v2204_v35  ;;  %2225 = vlog2.f32 %v1264_v29  ;;  %2048 = vmatprep.subr.bf16.mxu0 %v2456_v33 }
 0x157   : > { %v2208_v43 = vpop.eup %2207  ;;  %v1644_v44 = vadd.f32 %v2206_v40, %v2198_v26  ;;  %v1454_v45 = vmul.f32 %v2875_v5, %v1354_v36  ;;  %2227 = vpow2.f32 %v1759_v32  ;;  %1210 = vxpose.xlu1.b32.cont [10/16] (narrow) %v970_v37, 64  ;;  %v958_v32 = vld [vmem:[%s2818_s16 + $0x368] sm:$0xff]  ;;  %2050 = vmatpush3.bf16.xpose.msra.mxu0 %v2049_v27 }
 0x158   : > { %v2210_v46 = vpop.eup %2209  ;;  %v1657_v47 = vadd.f32 %v2208_v43, %v2200_v30  ;;  %2229 = vpow2.f32 %v1530_v41  ;;  %v1447_v48 = vmul.f32 %v2875_v5, %v1340_v42  ;;  %1178 = vxpose.xlu0.b32.cont [10/16] (narrow) %v954_v38, 64  ;;  %2051 = vmatprep.subr.bf16.mxu0 %v2456_v33  ;;  %v975_v38 = vld [vmem:[%s2818_s16 + $0x3f0] sm:$0xff]  ;;  %v1779_v43 = vld [vmem:[%s2820_s21 + $0x18] sm:$0xff] }
 0x159   : > { %v2212_v49 = vpop.eup %2211  ;;  %v1546_v50 = vmul.f32 1.442695, %v1454_v45  ;;  %v1356_v51 = vmul.f32 0.6931472, %v2210_v46  ;;  %2231 = vpow2.f32 %v1761_v39  ;;  %v959_v39 = vld [vmem:[%s2818_s16 + $0x370] sm:$0xff] }
 0x15a   : > { %v2214_v54 = vpop.eup %2213  ;;  %v1532_v55 = vmul.f32 1.442695, %v1447_v48  ;;  %v1342_v56 = vmul.f32 0.6931472, %v2212_v49  ;;  %v1778_v42 = vld [vmem:[%s2820_s21 + $0x10] sm:$0xff]  ;;  %v960_v48 = vld [vmem:[%s2818_s16 + $0x378] sm:$0xff] }
 0x15b   : > { %v2216_v57 = vpop.eup %2215  ;;  %v1645_v58 = vadd.f32 %v2214_v54, %v1644_v44  ;;  %2233 = vpow2.f32 %v1546_v50  ;;  %v1455_v59 = vmul.f32 %v2875_v5, %v1356_v51  ;;  %1211 = vxpose.xlu1.b32.cont [11/16] (narrow) %v971_v52, 64  ;;  %v2052_v45 = vpack.c.bf16 %v1779_v43, %v1778_v42 }
 0x15c   : > { %v2218_v60 = vpop.eup %2217  ;;  %v1658_v61 = vadd.f32 %v2216_v57, %v1657_v47  ;;  %2235 = vpow2.f32 %v1532_v55  ;;  %v1448_v62 = vmul.f32 %v2875_v5, %v1342_v56  ;;  %1179 = vxpose.xlu0.b32.cont [11/16] (narrow) %v955_v53, 64  ;;  %v976_v47 = vld [vmem:[%s2818_s16 + $0x3f8] sm:$0xff]  ;;  %v1780_v55 = vld [vmem:[%s2820_s21 + $0x20] sm:$0xff]  ;;  %v1781_v56 = vld [vmem:[%s2820_s21 + $0x28] sm:$0xff] }
 0x15d   : > { %v2220_v63 = vpop.eup %2219  ;;  %v1548_v0 = vmul.f32 1.442695, %v1455_v59  ;;  %v1358_v1 = vmul.f32 0.6931472, %v2218_v60 }
 0x15e   : > { %v2222_v6 = vpop.eup %2221  ;;  %v1534_v7 = vmul.f32 1.442695, %v1448_v62  ;;  %v1344_v8 = vmul.f32 0.6931472, %v2220_v63 }
 0x15f   : > { %v2224_v9 = vpop.eup %2223  ;;  %v1646_v10 = vadd.f32 %v2222_v6, %v1645_v58  ;;  %2237 = vpow2.f32 %v1548_v0  ;;  %v1456_v11 = vmul.f32 %v2875_v5, %v1358_v1  ;;  %1212 = vxpose.xlu1.b32.cont [12/16] (narrow) %v972_v3, 64  ;;  %2053 = vmatpush3.bf16.xpose.msra.mxu0 %v2052_v45  ;;  %v2055_v58 = vpack.c.bf16 %v1781_v56, %v1780_v55  ;;  %v1782_v3 = vld [vmem:[%s2820_s21 + $0x30] sm:$0xff] }
 0x160   : > { %v2226_v12 = vpop.eup %2225  ;;  %v1659_v13 = vadd.f32 %v2224_v9, %v1658_v61  ;;  %2239 = vpow2.f32 %v1534_v7  ;;  %v1449_v14 = vmul.f32 %v2875_v5, %v1344_v8  ;;  %1180 = vxpose.xlu0.b32.cont [12/16] (narrow) %v956_v4, 64  ;;  %2054 = vmatprep.subr.bf16.mxu0 %v2456_v33  ;;  %v1783_v4 = vld [vmem:[%s2820_s21 + $0x38] sm:$0xff]  ;;  %v2458_v45 = vmov 0.0  }
 0x161   : > { %v2228_v16 = vpop.eup %2227  ;;  %v1550_v17 = vmul.f32 1.442695, %v1456_v11  ;;  %v1360_v18 = vmul.f32 0.6931472, %v2226_v12  ;;  %v2058_v7 = vpack.c.bf16 %v1783_v4, %v1782_v3  ;;  %2045 = vmatprep.mubr.msk.f32.mxu0 %vm2457_vm1, %v2458_v45 }
 0x162   : > { %v2230_v20 = vpop.eup %2229  ;;  %v1536_v21 = vmul.f32 1.442695, %v1449_v14 }
 0x163   : > { %v2232_v24 = vpop.eup %2231  ;;  %v1647_v25 = vadd.f32 %v2230_v20, %v1646_v10  ;;  %2241 = vpow2.f32 %v1550_v17  ;;  %v1457_v26 = vmul.f32 %v2875_v5, %v1360_v18  ;;  %1213 = vxpose.xlu1.b32.cont [13/16] (narrow) %v973_v15, 64  ;;  %v1784_v15 = vld [vmem:[%s2820_s21 + $0x40] sm:$0xff] }
 0x164   : > { %2243 = vpow2.f32 %v1536_v21  ;;  %1181 = vxpose.xlu0.b32.cont [13/16] (narrow) %v957_v19, 64  ;;  %v2986_v28 = vsel %vm1800_vm0, %v2232_v24, %v2228_v16  ;;  %v1785_v16 = vld [vmem:[%s2820_s21 + $0x48] sm:$0xff]  ;;  %v1786_v21 = vld [vmem:[%s2820_s21 + $0x50] sm:$0xff] }
 0x165   : > { %v2234_v29 = vpop.eup %2233  ;;  %v1552_v30 = vmul.f32 1.442695, %v1457_v26  ;;  %v2061_v17 = vpack.c.bf16 %v1785_v16, %v1784_v15  ;;  %v2064_v24 = vpack.c.bf16 %v1787_v22, %v1786_v21 }
 0x166   : > { %v2236_v34 = vpop.eup %2235  ;;  %v1660_v35 = vadd.f32 %v2234_v29, %v1659_v13 }
 0x167   : > { %v1648_v36 = vadd.f32 %v2236_v34, %v1647_v25  ;;  %2245 = vpow2.f32 %v1552_v30  ;;  %1214 = vxpose.xlu1.b32.cont [14/16] (narrow) %v974_v31, 64  ;;  %2056 = vmatpush3.bf16.xpose.msra.mxu0 %v2055_v58 }
 0x168   : > { %1182 = vxpose.xlu0.b32.cont [14/16] (narrow) %v958_v32, 64  ;;  %2057 = vmatprep.subr.bf16.mxu0 %v2456_v33 }
 0x169   : > { %v2238_v37 = vpop.eup %2237 }
 0x16a   : > { %v2240_v40 = vpop.eup %2239  ;;  %v1661_v41 = vadd.f32 %v2238_v37, %v1660_v35  ;;  %v1788_v37 = vld [vmem:[%s2820_s21 + $0x60] sm:$0xff] }
 0x16b   : > { %v1649_v44 = vadd.f32 %v2240_v40, %v1648_v36  ;;  %1215 = vxpose.xlu1.b32.cont [15/16] (narrow) %v975_v38, 64  ;;  %v1789_v38 = vld [vmem:[%s2820_s21 + $0x68] sm:$0xff] }
 0x16c   : > { %1183 = vxpose.xlu0.b32.cont [15/16] (narrow) %v959_v39, 64 }
 0x16d   : > { %v2242_v46 = vpop.eup %2241 }
 0x16e   : > { %v2244_v49 = vpop.eup %2243  ;;  %v1662_v50 = vadd.f32 %v2242_v46, %v1661_v41  ;;  %v2067_v41 = vpack.c.bf16 %v1789_v38, %v1788_v37  ;;  %v1790_v46 = vld [vmem:[%s2820_s21 + $0x70] sm:$0xff] }
 0x16f   : > { %v1650_v51 = vadd.f32 %v2244_v49, %v1649_v44  ;;  %1216 = vxpose.xlu1.b32.end [16/16] (narrow) %v976_v47, 64  ;;  %2059 = vmatpush3.bf16.xpose.msra.mxu0 %v2058_v7  ;;  %v1791_v47 = vld [vmem:[%s2820_s21 + $0x78] sm:$0xff] }
 0x170   : > { %1184 = vxpose.xlu0.b32.end [16/16] (narrow) %v960_v48, 64  ;;  %2060 = vmatprep.subr.bf16.mxu0 %v2456_v33 }
 0x171   : > { %v2246_v52 = vpop.eup %2245  ;;  %v1651_v53 = vrot.slane %v1650_v51, 4 }
 0x172   : > { %v1663_v54 = vadd.f32 %v2246_v52, %v1662_v50  ;;  %v2070_v52 = vpack.c.bf16 %v1791_v47, %v1790_v46 }
 0x173   : > { %v1652_v57 = vadd.f32 %v1651_v53, %v1650_v51  ;;  %v1153_v11 = vpop.trf.xlu1 }
 0x174   : > { %v1664_v59 = vrot.slane %v1663_v54, 4  ;;  %v1121_v8 = vpop.trf.xlu0  ;;  %v1273_v35 = vmax.f32 %v1153_v11, 1e-06 }
 0x175   : > { %v1653_v60 = vrot.slane %v1652_v57, 2  ;;  %v1265_v32 = vmax.f32 %v1121_v8, 1e-06 }
 0x176   : > { %v1665_v61 = vadd.f32 %v1664_v59, %v1663_v54 }
 0x177   : > { %v1654_v62 = vadd.f32 %v1653_v60, %v1652_v57  ;;  %v1154_v18 = vpop.trf.xlu1  ;;  %2062 = vmatpush3.bf16.xpose.msra.mxu0 %v2061_v17 }
 0x178   : > { %v1666_v63 = vrot.slane %v1665_v61, 2  ;;  %v1122_v14 = vpop.trf.xlu0  ;;  %2063 = vmatprep.subr.bf16.mxu0 %v2456_v33  ;;  %v1274_v43 = vmax.f32 %v1154_v18, 1e-06 }
 0x179   : > { %v1655_v0 = vrot.slane %v1654_v62, 1  ;;  %v1266_v39 = vmax.f32 %v1122_v14, 1e-06 }
 0x17a   : > { %v1667_v1 = vadd.f32 %v1666_v63, %v1665_v61 }
 0x17b   : > { %v1656_v6 = vadd.f32 %v1655_v0, %v1654_v62  ;;  %v1155_v20 = vpop.trf.xlu1 }
 0x17c   : > { %v1668_v9 = vrot.slane %v1667_v1, 1  ;;  %v1123_v19 = vpop.trf.xlu0  ;;  %v1275_v49 = vmax.f32 %v1155_v20, 1e-06 }
 0x17d   : > { %v1725_v10 = vmul.f32 0.015625, %v1656_v6  ;;  %v1267_v48 = vmax.f32 %v1123_v19, 1e-06 }
 0x17e   : > { %v1669_v12 = vadd.f32 %v1668_v9, %v1667_v1 }
 0x17f   : > { %2247 = vlog2.f32 %v1725_v10  ;;  %2065 = vmatpush3.bf16.xpose.msra.mxu0 %v2064_v24  ;;  %v1156_v31 = vpop.trf.xlu1 }
 0x180   : > { %v1726_v13 = vmul.f32 0.015625, %v1669_v12  ;;  %v1124_v27 = vpop.trf.xlu0  ;;  %2066 = vmatprep.subr.bf16.mxu0 %v2456_v33  ;;  %v1276_v53 = vmax.f32 %v1156_v31, 1e-06 }
 0x181   : > { %v1268_v50 = vmax.f32 %v1124_v27, 1e-06 }
 0x182   : > { %2249 = vlog2.f32 %v1726_v13 }
 0x183   : > { %2251 = vlog2.f32 %v1265_v32  ;;  %v1157_v44 = vpop.trf.xlu1 }
 0x184   : > { %v1125_v40 = vpop.trf.xlu0  ;;  %2253 = vlog2.f32 %v1273_v35  ;;  %v1277_v56 = vmax.f32 %v1157_v44, 1e-06 }
 0x185   : > { %v1269_v54 = vmax.f32 %v1125_v40, 1e-06 }
 0x187   : > { %2068 = vmatpush3.bf16.xpose.msra.mxu0 %v2067_v41  ;;  %v1158_v55 = vpop.trf.xlu1 }
 0x188   : > { %2069 = vmatprep.subr.bf16.mxu0 %v2456_v33  ;;  %v1126_v51 = vpop.trf.xlu0  ;;  %v1278_v59 = vmax.f32 %v1158_v55, 1e-06 }
 0x189   : > { %v2248_v23 = vpop.eup %2247  ;;  %v1270_v57 = vmax.f32 %v1126_v51, 1e-06 }
 0x18a   : > { %v1736_v26 = vmul.f32 0.6931472, %v2248_v23 }
 0x18b   : > { %v1159_v1 = vpop.trf.xlu1 }
 0x18c   : > { %v2250_v25 = vpop.eup %2249  ;;  %v1753_v30 = vmul.f32 %v2957_v2, %v1736_v26  ;;  %v1127_v60 = vpop.trf.xlu0  ;;  %v1279_v6 = vmax.f32 %v1159_v1, 1e-06 }
 0x18d   : > { %v1738_v29 = vmul.f32 0.6931472, %v2250_v25  ;;  %v2252_v33 = vpop.eup %2251  ;;  %v1271_v62 = vmax.f32 %v1127_v60, 1e-06 }
 0x18e   : > { %v1763_v36 = vmul.f32 1.442695, %v1753_v30  ;;  %v2254_v58 = vpop.eup %2253  ;;  %v1362_v0 = vmul.f32 0.6931472, %v2252_v33 }
 0x18f   : > { %v1754_v34 = vmul.f32 %v2957_v2, %v1738_v29  ;;  %2071 = vmatpush3.bf16.xpose.msra.mxu0 %v2070_v52  ;;  %v1378_v9 = vmul.f32 0.6931472, %v2254_v58  ;;  %v1160_v19 = vpop.trf.xlu1 }
 0x190   : > { %2255 = vpow2.f32 %v1763_v36  ;;  %v1458_v11 = vmul.f32 %v2875_v5, %v1362_v0  ;;  %v1128_v16 = vpop.trf.xlu0  ;;  %v1280_v31 = vmax.f32 %v1160_v19, 1e-06 }
 0x191   : > { %v1765_v42 = vmul.f32 1.442695, %v1754_v34  ;;  %2257 = vlog2.f32 %v1266_v39  ;;  %v1272_v27 = vmax.f32 %v1128_v16, 1e-06 }
 0x192   : > { %v1554_v21 = vmul.f32 1.442695, %v1458_v11 }
 0x193   : > { %2259 = vpow2.f32 %v1765_v42 }
 0x194   : > { %2261 = vlog2.f32 %v1274_v43 }
 0x195   : > { %2263 = vlog2.f32 %v1267_v48 }
 0x196   : > { %2265 = vlog2.f32 %v1275_v49 }
 0x197   : > { %2267 = vlog2.f32 %v1268_v50 }
 0x198   : > { %2269 = vlog2.f32 %v1276_v53 }
 0x199   : > { %2271 = vlog2.f32 %v1269_v54 }
 0x19a   : > { %v2256_v61 = vpop.eup %2255  ;;  %2273 = vlog2.f32 %v1277_v56 }
 0x19b   : > { %v2258_v63 = vpop.eup %2257  ;;  %2275 = vlog2.f32 %v1270_v57  ;;  %v1803_v3 = vsel %vm1802_vm2, %v2256_v61, %v2986_v28  ;;  %v1466_v28 = vmul.f32 %v2875_v5, %v1378_v9 }
 0x19c   : > { %2277 = vlog2.f32 %v1278_v59  ;;  %v1364_v12 = vmul.f32 0.6931472, %v2258_v63 }
 0x19d   : > { %v2260_v4 = vpop.eup %2259  ;;  %2279 = vlog2.f32 %v1271_v62  ;;  %v1570_v32 = vmul.f32 1.442695, %v1466_v28 }
 0x19e   : > { %v2262_v7 = vpop.eup %2261  ;;  %v3019_v8 = vsel %vm1804_vm3, %v2260_v4, %v1803_v3  ;;  %2281 = vlog2.f32 %v1279_v6  ;;  %v1459_v22 = vmul.f32 %v2875_v5, %v1364_v12 }
 0x19f   : > { %v2264_v10 = vpop.eup %2263  ;;  %v1380_v14 = vmul.f32 0.6931472, %v2262_v7  ;;  %2283 = vpow2.f32 %v1554_v21 }
 0x1a0   : > { %v2266_v13 = vpop.eup %2265  ;;  %v1366_v18 = vmul.f32 0.6931472, %v2264_v10  ;;  %v1556_v37 = vmul.f32 1.442695, %v1459_v22  ;;  %2285 = vlog2.f32 %v1272_v27 }
 0x1a1   : > { %v2268_v15 = vpop.eup %2267  ;;  %v1382_v23 = vmul.f32 0.6931472, %v2266_v13  ;;  %v1467_v25 = vmul.f32 %v2875_v5, %v1380_v14  ;;  %2287 = vlog2.f32 %v1280_v31 }
 0x1a2   : > { %v2270_v17 = vpop.eup %2269  ;;  %v1368_v26 = vmul.f32 0.6931472, %v2268_v15  ;;  %v1460_v34 = vmul.f32 %v2875_v5, %v1366_v18  ;;  %2289 = vpow2.f32 %v1570_v32 }
 0x1a3   : > { %v2272_v20 = vpop.eup %2271  ;;  %v1384_v30 = vmul.f32 0.6931472, %v2270_v17  ;;  %v1468_v38 = vmul.f32 %v2875_v5, %v1382_v23  ;;  %v1572_v41 = vmul.f32 1.442695, %v1467_v25  ;;  %2291 = vpow2.f32 %v1556_v37 }
 0x1a4   : > { %v2274_v24 = vpop.eup %2273  ;;  %v1370_v35 = vmul.f32 0.6931472, %v2272_v20  ;;  %v1461_v42 = vmul.f32 %v2875_v5, %v1368_v26  ;;  %v1558_v46 = vmul.f32 1.442695, %v1460_v34 }
 0x1a5   : > { %v2276_v29 = vpop.eup %2275  ;;  %v1386_v39 = vmul.f32 0.6931472, %v2274_v24  ;;  %v1469_v44 = vmul.f32 %v2875_v5, %v1384_v30  ;;  %v1574_v49 = vmul.f32 1.442695, %v1468_v38  ;;  %2293 = vpow2.f32 %v1572_v41 }
 0x1a6   : > { %v2278_v36 = vpop.eup %2277  ;;  %v1372_v43 = vmul.f32 0.6931472, %v2276_v29  ;;  %v1462_v47 = vmul.f32 %v2875_v5, %v1370_v35  ;;  %v1560_v52 = vmul.f32 1.442695, %v1461_v42  ;;  %2295 = vpow2.f32 %v1558_v46 }
 0x1a7   : > { %v2280_v40 = vpop.eup %2279  ;;  %v1388_v48 = vmul.f32 0.6931472, %v2278_v36  ;;  %v1470_v50 = vmul.f32 %v2875_v5, %v1386_v39  ;;  %v1576_v54 = vmul.f32 1.442695, %v1469_v44  ;;  %2297 = vpow2.f32 %v1574_v49 }
 0x1a8   : > { %v2282_v45 = vpop.eup %2281  ;;  %v1374_v51 = vmul.f32 0.6931472, %v2280_v40  ;;  %v1463_v53 = vmul.f32 %v2875_v5, %v1372_v43  ;;  %v1562_v33 = vmul.f32 1.442695, %v1462_v47  ;;  %2299 = vpow2.f32 %v1560_v52 }
 0x1a9   : > { %v1390_v55 = vmul.f32 0.6931472, %v2282_v45  ;;  %v1471_v58 = vmul.f32 %v2875_v5, %v1388_v48  ;;  %v1578_v59 = vmul.f32 1.442695, %v1470_v50  ;;  %v2284_v62 = vpop.eup %2283  ;;  %2301 = vpow2.f32 %v1576_v54 }
 0x1aa   : > { %v1464_v60 = vmul.f32 %v2875_v5, %v1374_v51  ;;  %v1564_v61 = vmul.f32 1.442695, %v1463_v53  ;;  %v2286_v4 = vpop.eup %2285  ;;  %2303 = vpow2.f32 %v1562_v33 }
 0x1ab   : > { %v1472_v63 = vmul.f32 %v2875_v5, %v1390_v55  ;;  %v1580_v6 = vmul.f32 1.442695, %v1471_v58  ;;  %v2288_v7 = vpop.eup %2287  ;;  %2305 = vpow2.f32 %v1578_v59  ;;  %v1376_v14 = vmul.f32 0.6931472, %v2286_v4 }
 0x1ac   : > { %v1566_v9 = vmul.f32 1.442695, %v1464_v60  ;;  %v2290_v10 = vpop.eup %2289  ;;  %2307 = vpow2.f32 %v1564_v61  ;;  %v1392_v28 = vmul.f32 0.6931472, %v2288_v7 }
 0x1ad   : > { %v2292_v12 = vpop.eup %2291  ;;  %v1582_v13 = vmul.f32 1.442695, %v1472_v63  ;;  %v1465_v25 = vmul.f32 %v2875_v5, %v1376_v14 }
 0x1ae   : > { %v1670_v21 = vadd.f32 %v2292_v12, %v2284_v62  ;;  %v1473_v31 = vmul.f32 %v2875_v5, %v1392_v28 }
 0x1af   : > { %v2294_v17 = vpop.eup %2293  ;;  %v1568_v40 = vmul.f32 1.442695, %v1465_v25 }
 0x1b0   : > { %v2296_v20 = vpop.eup %2295  ;;  %v1683_v24 = vadd.f32 %v2294_v17, %v2290_v10  ;;  %v1584_v44 = vmul.f32 1.442695, %v1473_v31 }
 0x1b1   : > { %v2298_v23 = vpop.eup %2297  ;;  %v1671_v37 = vadd.f32 %v2296_v20, %v1670_v21 }
 0x1b2   : > { %v2300_v30 = vpop.eup %2299  ;;  %v1684_v39 = vadd.f32 %v2298_v23, %v1683_v24 }
 0x1b3   : > { %v1217_v56 = vpop.trf.xlu1  ;;  %v2302_v34 = vpop.eup %2301  ;;  %v1672_v49 = vadd.f32 %v2300_v30, %v1671_v37 }
 0x1b4   : > { %v1185_v57 = vpop.trf.xlu0  ;;  %v1289_v0 = vmax.f32 %v1217_v56, 1e-06  ;;  %v2304_v36 = vpop.eup %2303  ;;  %v1685_v51 = vadd.f32 %v2302_v34, %v1684_v39 }
 0x1b5   : > { %v1281_v11 = vmax.f32 %v1185_v57, 1e-06  ;;  %v2306_v38 = vpop.eup %2305  ;;  %v1673_v59 = vadd.f32 %v2304_v36, %v1672_v49 }
 0x1b6   : > { %2309 = vlog2.f32 %v1289_v0  ;;  %v2308_v43 = vpop.eup %2307  ;;  %v1686_v61 = vadd.f32 %v2306_v38, %v1685_v51 }
 0x1b7   : > { %v1218_v1 = vpop.trf.xlu1  ;;  %2311 = vpow2.f32 %v1580_v6  ;;  %v1674_v10 = vadd.f32 %v2308_v43, %v1673_v59 }
 0x1b8   : > { %v1186_v3 = vpop.trf.xlu0  ;;  %v1290_v18 = vmax.f32 %v1218_v1, 1e-06  ;;  %2313 = vpow2.f32 %v1566_v9 }
 0x1b9   : > { %v1282_v19 = vmax.f32 %v1186_v3, 1e-06  ;;  %2315 = vlog2.f32 %v1281_v11 }
 0x1ba   : > { %2317 = vpow2.f32 %v1582_v13 }
 0x1bb   : > { %v1219_v15 = vpop.trf.xlu1  ;;  %2319 = vlog2.f32 %v1290_v18 }
 0x1bc   : > { %v1187_v16 = vpop.trf.xlu0  ;;  %v1291_v22 = vmax.f32 %v1219_v15, 1e-06  ;;  %2321 = vlog2.f32 %v1282_v19 }
 0x1bd   : > { %v1283_v26 = vmax.f32 %v1187_v16, 1e-06 }
 0x1be   : > { %2323 = vlog2.f32 %v1291_v22 }
 0x1bf   : > { %v1220_v27 = vpop.trf.xlu1  ;;  %2325 = vlog2.f32 %v1283_v26 }
 0x1c0   : > { %v1188_v29 = vpop.trf.xlu0  ;;  %v1292_v32 = vmax.f32 %v1220_v27, 1e-06  ;;  %v2310_v46 = vpop.eup %2309 }
 0x1c1   : > { %v1284_v35 = vmax.f32 %v1188_v29, 1e-06  ;;  %v2312_v48 = vpop.eup %2311  ;;  %v1410_v55 = vmul.f32 0.6931472, %v2310_v46 }
 0x1c2   : > { %2327 = vlog2.f32 %v1292_v32  ;;  %v2314_v50 = vpop.eup %2313  ;;  %v1687_v13 = vadd.f32 %v2312_v48, %v1686_v61 }
 0x1c3   : > { %v1221_v41 = vpop.trf.xlu1  ;;  %2329 = vlog2.f32 %v1284_v35  ;;  %v2316_v54 = vpop.eup %2315  ;;  %v1482_v3 = vmul.f32 %v2875_v5, %v1410_v55  ;;  %v1675_v25 = vadd.f32 %v2314_v50, %v1674_v10 }
 0x1c4   : > { %v1189_v42 = vpop.trf.xlu0  ;;  %v1293_v45 = vmax.f32 %v1221_v41, 1e-06  ;;  %v2318_v57 = vpop.eup %2317  ;;  %v1394_v62 = vmul.f32 0.6931472, %v2316_v54 }
 0x1c5   : > { %v1285_v47 = vmax.f32 %v1189_v42, 1e-06  ;;  %v2320_v58 = vpop.eup %2319  ;;  %v1602_v28 = vmul.f32 1.442695, %v1482_v3  ;;  %v1688_v31 = vadd.f32 %v2318_v57, %v1687_v13 }
 0x1c6   : > { %2331 = vlog2.f32 %v1293_v45  ;;  %v2322_v60 = vpop.eup %2321  ;;  %v1412_v7 = vmul.f32 0.6931472, %v2320_v58  ;;  %v1474_v14 = vmul.f32 %v2875_v5, %v1394_v62 }
 0x1c7   : > { %2333 = vpow2.f32 %v1568_v40  ;;  %v1222_v52 = vpop.trf.xlu1  ;;  %v1396_v11 = vmul.f32 0.6931472, %v2322_v60 }
 0x1c8   : > { %v1190_v53 = vpop.trf.xlu0  ;;  %2335 = vpow2.f32 %v1584_v44  ;;  %v1294_v56 = vmax.f32 %v1222_v52, 1e-06  ;;  %v2324_v1 = vpop.eup %2323  ;;  %v1483_v20 = vmul.f32 %v2875_v5, %v1412_v7  ;;  %v1586_v32 = vmul.f32 1.442695, %v1474_v14 }
 0x1c9   : > { %2337 = vlog2.f32 %v1285_v47  ;;  %v1286_v33 = vmax.f32 %v1190_v53, 1e-06  ;;  %v2326_v6 = vpop.eup %2325  ;;  %v1414_v15 = vmul.f32 0.6931472, %v2324_v1  ;;  %v1475_v26 = vmul.f32 %v2875_v5, %v1396_v11 }
 0x1ca   : > { %2339 = vlog2.f32 %v1294_v56  ;;  %v1398_v18 = vmul.f32 0.6931472, %v2326_v6  ;;  %v1604_v40 = vmul.f32 1.442695, %v1483_v20 }
 0x1cb   : > { %v1223_v63 = vpop.trf.xlu1  ;;  %2341 = vlog2.f32 %v1286_v33  ;;  %v1484_v34 = vmul.f32 %v2875_v5, %v1414_v15  ;;  %v1588_v44 = vmul.f32 1.442695, %v1475_v26 }
 0x1cc   : > { %v1191_v0 = vpop.trf.xlu0  ;;  %v1295_v4 = vmax.f32 %v1223_v63, 1e-06  ;;  %v2328_v9 = vpop.eup %2327  ;;  %v1476_v37 = vmul.f32 %v2875_v5, %v1398_v18 }
 0x1cd   : > { %v2330_v12 = vpop.eup %2329  ;;  %v1416_v21 = vmul.f32 0.6931472, %v2328_v9  ;;  %v1287_v22 = vmax.f32 %v1191_v0, 1e-06  ;;  %v1606_v48 = vmul.f32 1.442695, %v1484_v34 }
 0x1ce   : > { %2343 = vlog2.f32 %v1295_v4  ;;  %v1400_v27 = vmul.f32 0.6931472, %v2330_v12  ;;  %v1590_v51 = vmul.f32 1.442695, %v1476_v37 }
 0x1cf   : > { %v1224_v16 = vpop.trf.xlu1  ;;  %2345 = vpow2.f32 %v1602_v28  ;;  %v1485_v41 = vmul.f32 %v2875_v5, %v1416_v21 }
 0x1d0   : > { %v2332_v17 = vpop.eup %2331  ;;  %v1192_v23 = vpop.trf.xlu0  ;;  %v1296_v29 = vmax.f32 %v1224_v16, 1e-06  ;;  %2347 = vlog2.f32 %v1287_v22  ;;  %v1477_v45 = vmul.f32 %v2875_v5, %v1400_v27 }
 0x1d1   : > { %v2334_v19 = vpop.eup %2333  ;;  %v1418_v35 = vmul.f32 0.6931472, %v2332_v17  ;;  %v1288_v39 = vmax.f32 %v1192_v23, 1e-06  ;;  %v1608_v54 = vmul.f32 1.442695, %v1485_v41 }
 0x1d2   : > { %v2336_v24 = vpop.eup %2335  ;;  %v1676_v43 = vadd.f32 %v2334_v19, %v1675_v25  ;;  %2349 = vlog2.f32 %v1296_v29  ;;  %v1592_v33 = vmul.f32 1.442695, %v1477_v45 }
 0x1d3   : > { %v2338_v30 = vpop.eup %2337  ;;  %v1689_v47 = vadd.f32 %v2336_v24, %v1688_v31  ;;  %2351 = vpow2.f32 %v1586_v32  ;;  %v1486_v49 = vmul.f32 %v2875_v5, %v1418_v35 }
 0x1d4   : > { %v2340_v36 = vpop.eup %2339  ;;  %v1402_v38 = vmul.f32 0.6931472, %v2338_v30  ;;  %2353 = vlog2.f32 %v1288_v39  ;;  %v1677_v57 = vrot.slane %v1676_v43, 4 }
 0x1d5   : > { %v1420_v42 = vmul.f32 0.6931472, %v2340_v36  ;;  %v2342_v46 = vpop.eup %2341  ;;  %2355 = vpow2.f32 %v1604_v40  ;;  %v1610_v59 = vmul.f32 1.442695, %v1486_v49  ;;  %v1690_v62 = vrot.slane %v1689_v47, 4 }
 0x1d6   : > { %v1478_v52 = vmul.f32 %v2875_v5, %v1402_v38  ;;  %v1404_v53 = vmul.f32 0.6931472, %v2342_v46  ;;  %2357 = vpow2.f32 %v1588_v44  ;;  %v1678_v1 = vadd.f32 %v1677_v57, %v1676_v43 }
 0x1d7   : > { %v1487_v55 = vmul.f32 %v2875_v5, %v1420_v42  ;;  %2359 = vpow2.f32 %v1606_v48  ;;  %v1691_v11 = vadd.f32 %v1690_v62, %v1689_v47 }
 0x1d8   : > { %v2344_v50 = vpop.eup %2343  ;;  %v1479_v58 = vmul.f32 %v2875_v5, %v1404_v53  ;;  %2361 = vpow2.f32 %v1590_v51  ;;  %v1594_v61 = vmul.f32 1.442695, %v1478_v52  ;;  %v1679_v14 = vrot.slane %v1678_v1, 2 }
 0x1d9   : > { %v1422_v56 = vmul.f32 0.6931472, %v2344_v50  ;;  %2363 = vpow2.f32 %v1608_v54  ;;  %v1612_v63 = vmul.f32 1.442695, %v1487_v55  ;;  %v2346_v0 = vpop.eup %2345  ;;  %v1692_v21 = vrot.slane %v1691_v11, 2 }
 0x1da   : > { %2365 = vpow2.f32 %v1592_v33  ;;  %v1596_v3 = vmul.f32 1.442695, %v1479_v58  ;;  %v2348_v4 = vpop.eup %2347  ;;  %v1680_v25 = vadd.f32 %v1679_v14, %v1678_v1 }
 0x1db   : > { %v1488_v60 = vmul.f32 %v2875_v5, %v1422_v56  ;;  %2367 = vpow2.f32 %v1610_v59  ;;  %v1406_v9 = vmul.f32 0.6931472, %v2348_v4  ;;  %v1693_v35 = vadd.f32 %v1692_v21, %v1691_v11 }
 0x1dc   : > { %v2350_v7 = vpop.eup %2349  ;;  %2369 = vpow2.f32 %v1594_v61  ;;  %v1681_v37 = vrot.slane %v1680_v25, 1 }
 0x1dd   : > { %v1614_v6 = vmul.f32 1.442695, %v1488_v60  ;;  %v2352_v10 = vpop.eup %2351  ;;  %2371 = vpow2.f32 %v1612_v63  ;;  %v1424_v12 = vmul.f32 0.6931472, %v2350_v7  ;;  %v1480_v15 = vmul.f32 %v2875_v5, %v1406_v9 }
 0x1de   : > { %v2354_v13 = vpop.eup %2353  ;;  %2373 = vpow2.f32 %v1596_v3  ;;  %v1694_v44 = vrot.slane %v1693_v35, 1  ;;  %v1682_v45 = vadd.f32 %v1681_v37, %v1680_v25 }
 0x1df   : > { %v2356_v16 = vpop.eup %2355  ;;  %2375 = vpow2.f32 %v1614_v6  ;;  %v1489_v17 = vmul.f32 %v2875_v5, %v1424_v12  ;;  %v1408_v28 = vmul.f32 0.6931472, %v2354_v13  ;;  %v1598_v19 = vmul.f32 1.442695, %v1480_v15 }
 0x1e0   : > { %v2358_v18 = vpop.eup %2357  ;;  %v1709_v26 = vadd.f32 %v2356_v16, %v2346_v0  ;;  %v1695_v52 = vadd.f32 %v1694_v44, %v1693_v35  ;;  %v1727_v53 = vmul.f32 0.015625, %v1682_v45 }
 0x1e1   : > { %v2360_v20 = vpop.eup %2359  ;;  %v1616_v22 = vmul.f32 1.442695, %v1489_v17  ;;  %v1481_v23 = vmul.f32 %v2875_v5, %v1408_v28  ;;  %2377 = vpow2.f32 %v1598_v19  ;;  %v1696_v31 = vadd.f32 %v2358_v18, %v2352_v10 }
 0x1e2   : > { %v2362_v24 = vpop.eup %2361  ;;  %v1710_v32 = vadd.f32 %v2360_v20, %v1709_v26  ;;  %v1728_v58 = vmul.f32 0.015625, %v1695_v52 }
 0x1e3   : > { %v2364_v27 = vpop.eup %2363  ;;  %2379 = vpow2.f32 %v1616_v22  ;;  %v1600_v29 = vmul.f32 1.442695, %v1481_v23  ;;  %v1697_v38 = vadd.f32 %v2362_v24, %v1696_v31 }
 0x1e4   : > { %v2366_v30 = vpop.eup %2365  ;;  %v1711_v39 = vadd.f32 %v2364_v27, %v1710_v32 }
 0x1e5   : > { %v2368_v34 = vpop.eup %2367  ;;  %2381 = vpow2.f32 %v1600_v29  ;;  %v1698_v5 = vadd.f32 %v2366_v30, %v1697_v38 }
 0x1e6   : > { %v2370_v36 = vpop.eup %2369  ;;  %v1712_v42 = vadd.f32 %v2368_v34, %v1711_v39  ;;  %2383 = vlog2.f32 %v1727_v53 }
 0x1e7   : > { %v2372_v40 = vpop.eup %2371  ;;  %v1699_v46 = vadd.f32 %v2370_v36, %v1698_v5  ;;  %2385 = vlog2.f32 %v1728_v58 }
 0x1e8   : > { %v2374_v41 = vpop.eup %2373  ;;  %v1713_v47 = vadd.f32 %v2372_v40, %v1712_v42 }
 0x1e9   : > { %v2376_v43 = vpop.eup %2375  ;;  %v1700_v49 = vadd.f32 %v2374_v41, %v1699_v46 }
 0x1ea   : > { %v1714_v50 = vadd.f32 %v2376_v43, %v1713_v47 }
 0x1eb   : > { %v2378_v48 = vpop.eup %2377 }
 0x1ec   : > { %v1701_v54 = vadd.f32 %v2378_v48, %v1700_v49 }
 0x1ed   : > { %v2380_v51 = vpop.eup %2379 }
 0x1ee   : > { %v1715_v55 = vadd.f32 %v2380_v51, %v1714_v50 }
 0x1ef   : > { %v2382_v56 = vpop.eup %2381 }
 0x1f0   : > { %v1716_v57 = vrot.slane %v1715_v55, 4  ;;  %v1702_v33 = vadd.f32 %v2382_v56, %v1701_v54  ;;  %v2384_v7 = vpop.eup %2383 }
 0x1f1   : > { %v2386_v12 = vpop.eup %2385  ;;  %v1740_v13 = vmul.f32 0.6931472, %v2384_v7 }
 0x1f2   : > { %v1717_v59 = vadd.f32 %v1716_v57, %v1715_v55  ;;  %v1703_v60 = vrot.slane %v1702_v33, 4  ;;  %v1742_v14 = vmul.f32 0.6931472, %v2386_v12 }
 0x1f3   : > { %v1755_v15 = vmul.f32 %v2957_v2, %v1740_v13 }
 0x1f4   : > { %v1718_v61 = vrot.slane %v1717_v59, 2  ;;  %v1704_v62 = vadd.f32 %v1703_v60, %v1702_v33  ;;  %v1756_v16 = vmul.f32 %v2957_v2, %v1742_v14 }
 0x1f5   : > { %v1767_v17 = vmul.f32 1.442695, %v1755_v15 }
 0x1f6   : > { %v1719_v63 = vadd.f32 %v1718_v61, %v1717_v59  ;;  %v1705_v0 = vrot.slane %v1704_v62, 2  ;;  %v1769_v20 = vmul.f32 1.442695, %v1756_v16 }
 0x1f8   : > { %v1720_v1 = vrot.slane %v1719_v63, 1  ;;  %v1706_v3 = vadd.f32 %v1705_v0, %v1704_v62 }
 0x1fa   : > { %v1721_v4 = vadd.f32 %v1720_v1, %v1719_v63  ;;  %v1707_v6 = vrot.slane %v1706_v3, 1 }
 0x1fc   : > { %v1730_v9 = vmul.f32 0.015625, %v1721_v4  ;;  %v1708_v10 = vadd.f32 %v1707_v6, %v1706_v3 }
 0x1fe   : > { %2387 = vlog2.f32 %v1730_v9  ;;  %v1729_v11 = vmul.f32 0.015625, %v1708_v10 }
 0x200   : > { %2389 = vlog2.f32 %v1729_v11 }
 0x201   : > { %2391 = vpow2.f32 %v1767_v17 }
 0x202   : > { %2393 = vpow2.f32 %v1769_v20 }
 0x208   : > { %v2388_v28 = vpop.eup %2387 }
 0x209   : > { %v1746_v18 = vmul.f32 0.6931472, %v2388_v28 }
 0x20a   : > { %v2390_v19 = vpop.eup %2389 }
 0x20b   : > { %v1744_v21 = vmul.f32 0.6931472, %v2390_v19  ;;  %v1758_v22 = vmul.f32 %v2957_v2, %v1746_v18  ;;  %v2392_v26 = vpop.eup %2391 }
 0x20c   : > { %v2394_v27 = vpop.eup %2393  ;;  %v1807_v29 = vsel %vm1806_vm4, %v2392_v26, %v3019_v8  ;;  %v1990_v8 = vld [vmem:[%s3098_s3] ss:$0 sm:$0xff] (!%p1989_p9) }
 0x20d   : > { %v1757_v23 = vmul.f32 %v2957_v2, %v1744_v21  ;;  %v1773_v24 = vmul.f32 1.442695, %v1758_v22  ;;  %v1809_v32 = vsel %vm1808_vm5, %v2394_v27, %v1807_v29  ;;  %v1775_v2 = vld [vmem:[#allocation5] sm:$0xff] }
 0x20f   : > { %v1771_v25 = vmul.f32 1.442695, %v1757_v23  ;;  %2395 = vpow2.f32 %v1773_v24 }
 0x211   : > { %2397 = vpow2.f32 %v1771_v25 }
 0x219   : > { %v2396_v30 = vpop.eup %2395 }
 0x21b   : > { %v2398_v31 = vpop.eup %2397 }
 0x21c   : > { %v1811_v34 = vsel %vm1810_vm6, %v2398_v31, %v1809_v32 }
 0x21d   : > { %v1813_v35 = vsel %vm1812_vm7, %v2396_v30, %v1811_v34 }
 0x21e   : > { %2046 = vmatmul.mubr.f32.vlgmr.msra.gmra.mrb[0].mxu0 %v1813_v35 }
 0x2ee   : > { %1890 = sbr.rel (%p1989_p9) target bundleno = 926 (0x39e), region = 120 }
 0x2f1   : > { %v1881_v36 = vpop.f32.mrb[0].mxu0 }
 0x2f2   : > { %v1885_v37 = vadd.f32 %v1881_v36, %v1775_v2  ;;  %v2047_v38 = vpop.f32.mrb[1].mxu0 }
 0x2f4   : > { %1886 = vst [vmem:[#allocation5] sm:$0xff] %v1885_v37 }
 0x2fb   : > { %v1891_v39 = vld [vmem:[#allocation5] sm:$0xff] }
 0x2fc   : > { %v1899_v40 = vadd.f32 %v1990_v8, %v1891_v39 }
 0x2fe   : > { %v1900_v41 = vmul.f32 %v1899_v40, %v1899_v40 }
 0x300   : > { %1901 = vadd.xlane.f32.xlu0 %v1900_v41 }
 0x38d   : > { %v1902_v5 = vpop.xlane.xlu0 %1901 }
 0x38e   : > { %v1903_v42 = vmax.f32 %v1902_v5, 1e-24 }
 0x390   : > { %2399 = vrsqrt.f32 %v1903_v42 }
 0x39a   : > { %v2400_v43 = vpop.eup %2399 }
 0x39b   : > { %v1905_v44 = vmul.f32 %v2400_v43, %v1899_v40 }
 0x39d   : > { %1906 = vst [vmem:[#allocation5] sm:$0xff] %v1905_v44 }
 0x39e PF: > { %p2078_p10 = scmp.eq.s32.totalorder %s2504_s0, 1  ;;  %s2459_s25 = smov [#allocation5]  }
 0x39f   : > { %s1914_s26 = sshll.u32 %s2459_s25, 4  ;;  %s1915_s26 = int_to_ptr.vmem [resolvable:$true] %s1914_s26 }
 0x3a0   : > { %s2401_s27 = scalar_lea.vmem %s1915_s26, 128  ;;  %p2408_p0 = scmp.lt.s32.totalorder %s1915_s26, %s1915_s26 }
 0x3a1   : > { %p2402_p11 = scmp.ne.s32.totalorder %s1915_s26, %s2401_s27  ;;  %p2409_p1 = scmp.lt.s32.totalorder %s2401_s27, %s2401_s27 }
 0x3a3   : > { %p2403_p12 = pnand %p2402_p11, %p2078_p10  ;;  %p2410_p2 = por %p2409_p1, %p2408_p0 }
 0x3a5   : > { %p2404_p13 = pneg %p2403_p12 }
 0x3a7   : > { %p2411_p3 = pnand %p2410_p2, %p2404_p13 }
 0x3a9   : > { %2414 = shalt.err (!%p2411_p3)
}
 0x3aa   : > { %s2415_s30 = scalar_lea.hbm %s3099_s4, 128 }
 0x3ab   : > { %p2416_p4 = scmp.ne.s32.totalorder %s3099_s4, %s2415_s30  ;;  %p2421_p7 = scmp.lt.u32.totalorder %s2415_s30, %s3099_s4 }
 0x3ad   : > { %p2417_p5 = pnand %p2416_p4, %p2078_p10 }
 0x3af   : > { %p2418_p6 = pneg %p2417_p5 }
 0x3b1   : > { %p2423_p8 = pnand %p2421_p7, %p2418_p6 }
 0x3b3   : > { %2426 = shalt.err (!%p2423_p8)
}
 0x3b4   : > { %2075 = dma.vmem_to_hbm [thread:$0]  (%p2078_p10), %s1915_s26, 128, %s3099_s4, [#allocation6]  }
 0x3b5   : > { %2440 = dma.done.wait (%p2078_p10), [#allocation6], 128  }
 0x3b6   : > { %2442 = vsyncadd (%p2078_p10), [#allocation6], 4294967168 }
 0x3b7 PF: > { %p13_p9 = scmp.ge.s32.totalorder %s2507_s20, 4   ;;  %s3101_s17 = smov %s2449_s18 }
 0x3b8   : > { %s3102_s18 = smov %s2516_s23  ;;  %s3103_s19 = smov %s2507_s20 }
 0x3b9   :  { %15 = sbr.rel (!%p13_p9) target bundleno = 4 (0x4), region = 160 }
 0x3c0   :  { %1927 = vsyncpa [#allocation6], 1 }
 0x3c1   :  { %1929 = vsyncpa [#allocation6 + $0x1], 1 }

</bundles_post_ra>
